<compile_context>
chip_gen: v6e
topology: v6e:2x2x1
jax: 0.10.0
libtpu: 0.0.40
codegen_flags: <defaults>
</compile_context>

<pallas_src>
import math
from functools import partial

import jax
import jax.numpy as jnp
from jax import lax
from jax.experimental import pallas as pl
from jax.experimental.pallas import tpu as pltpu


# ----------------------------------------------------------------------------
# small helpers
# ----------------------------------------------------------------------------
def _gelu_exact(x):
    # nn.GELU() default = exact erf-based GELU.
    return 0.5 * x * (1.0 + lax.erf(x / jnp.sqrt(jnp.float32(2.0))))


def _layer_norm(v, g, b, eps=1e-5):
    mu = jnp.mean(v, axis=-1, keepdims=True)
    var = jnp.mean(jnp.square(v - mu), axis=-1, keepdims=True)
    return (v - mu) * lax.rsqrt(var + eps) * g + b


def cast_matmul_weights(params, dtype=jnp.bfloat16):
    """Optional production helper: cast parameters to bf16 (v6e/v7x MXU, half the
    weight DMA/VMEM).  Kernels accumulate in f32 regardless.  weight-norm g stays f32."""
    def cast(path, leaf):
        name = path[-1].key if hasattr(path[-1], "key") else ""
        return leaf if name == "g" else leaf.astype(dtype)
    return jax.tree_util.tree_map_with_path(cast, params)


# ----------------------------------------------------------------------------
# 1) fused encoder body: embedding + cls + n_layers pre-norm encoder layers
#    grid = (batch tiles, layers);  activation resident in VMEM scratch
# ----------------------------------------------------------------------------
def _encoder_body_kernel(x_ref, we_ref, be_ref, cls_ref,
                         ln1g_ref, ln1b_ref, wqkv_ref, bqkv_ref, wo_ref, bo_ref,
                         ln2g_ref, ln2b_ref, wf1_ref, bf1_ref, wf2_ref, bf2_ref,
                         cls_out_ref, h_ref, *, n_heads, seq_len):
    layer = pl.program_id(1)
    bm, Tp, D = h_ref.shape
    T = seq_len + 1                       # real token count (cls + S); Tp >= T padded
    Dh = D // n_heads
    inv_sqrt_dh = 1.0 / math.sqrt(Dh)

    # ---- layer-0 prologue: embedding Linear (VPU FMAs over the tiny feature axis),
    #      cls-token prepend and zero padding up to the sublane-aligned Tp ----
    @pl.when(layer == 0)
    def _():
        xf = x_ref[...].astype(jnp.float32)                    # (bm, S, n_feat)
        n_feat = xf.shape[-1]
        we = we_ref[...].astype(jnp.float32)                   # (n_feat, D)
        emb = jnp.broadcast_to(be_ref[...].astype(jnp.float32), (bm, seq_len, D))
        for f in range(n_feat):                                # K=3 -> VPU FMAs, not MXU
            emb = emb + xf[:, :, f:f + 1] * we[f:f + 1, :]
        cls_tok = jnp.broadcast_to(
            cls_ref[...].astype(jnp.float32).reshape(1, 1, D), (bm, 1, D))
        h_ref[...] = jnp.zeros((bm, Tp, D), jnp.float32)       # deterministic padding rows
        h_ref[:, 0:1, :] = cls_tok                             # row 0 = cls token
        h_ref[:, 1:T, :] = emb

    # ---- one pre-norm TransformerEncoderLayer on the VMEM-resident activation ----
    x2 = h_ref[...].reshape(bm * Tp, D)                        # f32

    # self-attention: fused QKV projection, per-head score/attend, single out-proj
    xn = _layer_norm(x2, ln1g_ref[...], ln1b_ref[...]).astype(wqkv_ref.dtype)
    qkv = jnp.dot(xn, wqkv_ref[...],
                  preferred_element_type=jnp.float32) + bqkv_ref[...]   # (bm*Tp, 3D)

    if Tp > T:
        key_valid = lax.broadcasted_iota(jnp.int32, (1, 1, Tp), 2) < T
    # TODO(synk): use_mask=True (pT==0 key masking) / pos_encoding / dropout paths are
    # non-default or train-only in the module and are not implemented here.
    heads = []
    for h in range(n_heads):
        q = qkv[:, h * Dh:(h + 1) * Dh].reshape(bm, Tp, Dh) * inv_sqrt_dh
        k = qkv[:, D + h * Dh:D + (h + 1) * Dh].reshape(bm, Tp, Dh)
        v = qkv[:, 2 * D + h * Dh:2 * D + (h + 1) * Dh].reshape(bm, Tp, Dh)
        s = jnp.einsum("btd,bsd->bts", q, k, preferred_element_type=jnp.float32)
        if Tp > T:
            s = jnp.where(key_valid, s, jnp.float32(-1e30))    # mask padded keys
        s = s - jnp.max(s, axis=-1, keepdims=True)
        p = jnp.exp(s)
        p = p * pl.reciprocal(jnp.sum(p, axis=-1, keepdims=True), approx=True)
        heads.append(jnp.einsum("bts,bsd->btd", p, v, preferred_element_type=jnp.float32))
    attn = jnp.concatenate(heads, axis=-1).reshape(bm * Tp, D)
    y2 = x2 + jnp.dot(attn.astype(wo_ref.dtype), wo_ref[...],
                      preferred_element_type=jnp.float32) + bo_ref[...]

    # feed-forward (ReLU = torch TransformerEncoderLayer default activation)
    yn = _layer_norm(y2, ln2g_ref[...], ln2b_ref[...]).astype(wf1_ref.dtype)
    hmid = jnp.dot(yn, wf1_ref[...], preferred_element_type=jnp.float32) + bf1_ref[...]
    hmid = jnp.maximum(hmid, 0.0).astype(wf2_ref.dtype)
    ff = jnp.dot(hmid, wf2_ref[...], preferred_element_type=jnp.float32) + bf2_ref[...]
    h_new = (y2 + ff).reshape(bm, Tp, D)
    h_ref[...] = h_new

    # final layer: emit only the CLS row (== x[0] after the module's (S,B,D) transpose)
    @pl.when(layer == pl.num_programs(1) - 1)
    def _():
        cls_out_ref[...] = h_new[:, 0, :].astype(cls_out_ref.dtype)


def encoder_body(x, params, *, n_heads, bm=None, pad_to=8):
    B, S, n_feat = x.shape
    lp = params["layers"]
    L, D, _ = lp["wqkv"].shape
    Fff = lp["wf1"].shape[2]
    T = S + 1
    Tp = ((T + pad_to - 1) // pad_to) * pad_to           # sublane-aligned token axis

    if bm is None:
        bm = min(B, max(1, 256 // Tp))                   # aim bm*Tp ~ 256 (v6e/v7x MXU)
        while B % bm:
            bm -= 1
    assert B % bm == 0

    lspec = lambda s: pl.BlockSpec((None,) + s, lambda i, l: (l, 0, 0))   # per-layer weights
    cspec = lambda s: pl.BlockSpec(s, lambda i, l: (0, 0))                # layer-constant

    return pl.pallas_call(
        partial(_encoder_body_kernel, n_heads=n_heads, seq_len=S),
        out_shape=jax.ShapeDtypeStruct((B, D), jnp.float32),
        grid_spec=pltpu.PrefetchScalarGridSpec(
            num_scalar_prefetch=0,
            grid=(B // bm, L),
            in_specs=[
                pl.BlockSpec((bm, S, n_feat), lambda i, l: (i, 0, 0)),    # raw particles
                cspec((n_feat, D)), cspec((1, D)), cspec((1, D)),         # We, be, cls
                lspec((1, D)), lspec((1, D)),                             # ln1 g/b
                lspec((D, 3 * D)), lspec((1, 3 * D)),                     # fused Wqkv, bqkv
                lspec((D, D)), lspec((1, D)),                             # Wo, bo
                lspec((1, D)), lspec((1, D)),                             # ln2 g/b
                lspec((D, Fff)), lspec((1, Fff)),                         # ffn W1, b1
                lspec((Fff, D)), lspec((1, D)),                           # ffn W2, b2
            ],
            out_specs=pl.BlockSpec((bm, D), lambda i, l: (i, 0)),         # CLS row only
            scratch_shapes=[pltpu.VMEM((bm, Tp, D), jnp.float32)],        # resident h
        ),
        compiler_params=pltpu.CompilerParams(
            dimension_semantics=("parallel", "arbitrary")),
    )(x, params["embed_w"], params["embed_b"], params["cls_token"],
      lp["ln1_g"], lp["ln1_b"], lp["wqkv"], lp["bqkv"], lp["wo"], lp["bo"],
      lp["ln2_g"], lp["ln2_b"], lp["wf1"], lp["bf1"], lp["wf2"], lp["bf2"])


# ----------------------------------------------------------------------------
# 2) fused downsize MLP + DINO head (GELU MLP -> L2 normalize -> weight-norm'd
#    linear with V streamed over the output axis, z resident in VMEM)
# ----------------------------------------------------------------------------
def _head_kernel(x_ref, dw1_ref, db1_ref, dw2_ref, db2_ref,
                 w1_ref, b1_ref, w2_ref, b2_ref, w3_ref, b3_ref,
                 v_ref, scale_ref, out_ref, z_ref):
    @pl.when(pl.program_id(1) == 0)
    def _():
        c = x_ref[...].astype(dw1_ref.dtype)
        # downsize MLP: model_dim -> 32 -> embed_dim (ReLU), fused (sub-128 widths
        # would otherwise produce masked stores + an extra HBM round trip).
        t = jnp.dot(c, dw1_ref[...], preferred_element_type=jnp.float32) + db1_ref[...]
        t = jnp.maximum(t, 0.0).astype(dw2_ref.dtype)
        e = jnp.dot(t, dw2_ref[...], preferred_element_type=jnp.float32) + db2_ref[...]
        # DINO MLP (exact GELU)
        h = jnp.dot(e.astype(w1_ref.dtype), w1_ref[...],
                    preferred_element_type=jnp.float32) + b1_ref[...]
        h = _gelu_exact(h)
        h = jnp.dot(h.astype(w2_ref.dtype), w2_ref[...],
                    preferred_element_type=jnp.float32) + b2_ref[...]
        h = _gelu_exact(h)
        z = jnp.dot(h.astype(w3_ref.dtype), w3_ref[...],
                    preferred_element_type=jnp.float32) + b3_ref[...]
        # F.normalize(z, p=2, dim=-1, eps=1e-12) via rsqrt on the squared norm.
        ss = jnp.sum(z * z, axis=-1, keepdims=True)
        z_ref[...] = z * lax.rsqrt(jnp.maximum(ss, 1e-24))

    # weight-norm'd last layer: (z @ V_tile) * (g / ||V||_col), scale hoisted to wrapper.
    out_ref[...] = (jnp.dot(z_ref[...].astype(v_ref.dtype), v_ref[...],
                            preferred_element_type=jnp.float32)
                    * scale_ref[...]).astype(out_ref.dtype)


def dino_head_forward(cls_in, down_p, head_p, *, bm=None, tn=None):
    B, D = cls_in.shape
    down_hidden = down_p["w1"].shape[1]
    E = down_p["w2"].shape[1]
    hidden = head_p["w1"].shape[1]
    bottleneck = head_p["w3"].shape[1]
    out_dim = head_p["v"].shape[1]

    bm = min(B, 128) if bm is None else bm          # production: 128 (v5e) / 256 (v6e/v7x)
    assert B % bm == 0
    tn = min(out_dim, 2048) if tn is None else tn   # production: 1-4K wide V tiles
    assert out_dim % tn == 0

    # Hoisted weight-norm: per-output-column scale (commutes with the matmul).
    v = head_p["v"]
    scale = (head_p["g"].astype(jnp.float32) *
             lax.rsqrt(jnp.sum(jnp.square(v.astype(jnp.float32)), axis=0, keepdims=True)))

    const = lambda s: pl.BlockSpec(s, lambda i, j: (0, 0))
    return pl.pallas_call(
        _head_kernel,
        out_shape=jax.ShapeDtypeStruct((B, out_dim), jnp.float32),
        grid_spec=pltpu.PrefetchScalarGridSpec(
            num_scalar_prefetch=0,
            grid=(B // bm, out_dim // tn),
            in_specs=[
                pl.BlockSpec((bm, D), lambda i, j: (i, 0)),           # CLS embedding tile
                const((D, down_hidden)), const((1, down_hidden)),     # downsize W1, b1
                const((down_hidden, E)), const((1, E)),               # downsize W2, b2
                const((E, hidden)), const((1, hidden)),               # head W1, b1
                const((hidden, hidden)), const((1, hidden)),          # head W2, b2
                const((hidden, bottleneck)), const((1, bottleneck)),  # head W3, b3
                pl.BlockSpec((bottleneck, tn), lambda i, j: (0, j)),  # V streamed over N
                pl.BlockSpec((1, tn), lambda i, j: (0, j)),           # hoisted g/||V|| scale
            ],
            out_specs=pl.BlockSpec((bm, tn), lambda i, j: (i, j)),
            scratch_shapes=[pltpu.VMEM((bm, bottleneck), jnp.float32)],
        ),
        compiler_params=pltpu.CompilerParams(
            dimension_semantics=("parallel", "arbitrary")),
    )(cls_in, down_p["w1"], down_p["b1"], down_p["w2"], down_p["b2"],
      head_p["w1"], head_p["b1"], head_p["w2"], head_p["b2"],
      head_p["w3"], head_p["b3"], v, scale)


# ----------------------------------------------------------------------------
# full forward
# ----------------------------------------------------------------------------
def transformer_encoder_forward(x, params, *, n_heads, body_bm=None, head_bm=None,
                                head_tn=None):
    cls = encoder_body(x, params, n_heads=n_heads, bm=body_bm)
    return dino_head_forward(cls, params["down"], params["head"], bm=head_bm, tn=head_tn)


# ----------------------------------------------------------------------------
# params + pure-JAX reference
# ----------------------------------------------------------------------------
def make_params(key, *, input_dim, model_dim, n_heads, dim_feedforward, n_layers,
                embed_dim, output_dim, hidden_dim_dino, bottleneck_dim_dino,
                dtype=jnp.float32):
    D, L, Fff = model_dim, n_layers, dim_feedforward
    keys = iter(jax.random.split(key, 16))

    def uniform(k, shape, bound):
        return jax.random.uniform(k, shape, jnp.float32, -bound, bound).astype(dtype)

    def trunc(k, shape, std=0.02):
        return (std * jax.random.truncated_normal(k, -2.0, 2.0, shape, jnp.float32)
                ).astype(dtype)

    zeros = lambda s: jnp.zeros(s, dtype)
    ones = lambda s: jnp.ones(s, dtype)

    p = {
        "embed_w": uniform(next(keys), (input_dim, D), 1.0 / math.sqrt(input_dim)),
        "embed_b": zeros((1, D)),
        "cls_token": zeros((1, D)),                 # nn.Parameter(torch.zeros(1, 1, D))
    }
    b_attn = math.sqrt(6.0 / (2 * D))
    p["layers"] = {                                 # per-layer weights stacked on axis 0
        "ln1_g": ones((L, 1, D)), "ln1_b": zeros((L, 1, D)),
        "ln2_g": ones((L, 1, D)), "ln2_b": zeros((L, 1, D)),
        "wqkv": uniform(next(keys), (L, D, 3 * D), b_attn),      # [Q | K | V], head-major
        "bqkv": zeros((L, 1, 3 * D)),
        "wo": uniform(next(keys), (L, D, D), 1.0 / math.sqrt(D)),
        "bo": zeros((L, 1, D)),
        "wf1": uniform(next(keys), (L, D, Fff), 1.0 / math.sqrt(D)),
        "bf1": zeros((L, 1, Fff)),
        "wf2": uniform(next(keys), (L, Fff, D), 1.0 / math.sqrt(Fff)),
        "bf2": zeros((L, 1, D)),
    }
    p["down"] = {
        "w1": uniform(next(keys), (D, 32), 1.0 / math.sqrt(D)),
        "b1": zeros((1, 32)),
        "w2": uniform(next(keys), (32, embed_dim), 1.0 / math.sqrt(32)),
        "b2": zeros((1, embed_dim)),
    }
    p["head"] = {
        "w1": trunc(next(keys), (embed_dim, hidden_dim_dino)),
        "b1": zeros((1, hidden_dim_dino)),
        "w2": trunc(next(keys), (hidden_dim_dino, hidden_dim_dino)),
        "b2": zeros((1, hidden_dim_dino)),
        "w3": trunc(next(keys), (hidden_dim_dino, bottleneck_dim_dino)),
        "b3": zeros((1, bottleneck_dim_dino)),
        "v": uniform(next(keys), (bottleneck_dim_dino, output_dim),
                     1.0 / math.sqrt(bottleneck_dim_dino)),
        "g": jnp.ones((1, output_dim), jnp.float32),   # weight_g filled with 1
    }
    return p


def reference_forward(x, params, *, n_heads):
    f32 = lambda a: a.astype(jnp.float32)
    B, S, _ = x.shape
    we = f32(params["embed_w"])
    D = we.shape[1]
    Dh = D // n_heads
    h = jnp.einsum("bsf,fd->bsd", f32(x), we) + f32(params["embed_b"])
    cls = jnp.broadcast_to(f32(params["cls_token"])[None], (B, 1, D))
    h = jnp.concatenate([cls, h], axis=1)

    def ln(v, g, b, eps=1e-5):
        mu = jnp.mean(v, axis=-1, keepdims=True)
        var = jnp.mean(jnp.square(v - mu), axis=-1, keepdims=True)
        return (v - mu) / jnp.sqrt(var + eps) * g + b

    lp = params["layers"]
    for l in range(lp["wqkv"].shape[0]):
        xn = ln(h, f32(lp["ln1_g"][l]), f32(lp["ln1_b"][l]))
        qkv = xn @ f32(lp["wqkv"][l]) + f32(lp["bqkv"][l])
        T = qkv.shape[1]
        q = qkv[..., :D].reshape(B, T, n_heads, Dh)
        k = qkv[..., D:2 * D].reshape(B, T, n_heads, Dh)
        v = qkv[..., 2 * D:].reshape(B, T, n_heads, Dh)
        s = jnp.einsum("bthd,bshd->bhts", q, k) / math.sqrt(Dh)
        pa = jax.nn.softmax(s, axis=-1)
        ah = jnp.einsum("bhts,bshd->bthd", pa, v).reshape(B, T, D)
        h = h + ah @ f32(lp["wo"][l]) + f32(lp["bo"][l])
        yn = ln(h, f32(lp["ln2_g"][l]), f32(lp["ln2_b"][l]))
        ff = jnp.maximum(yn @ f32(lp["wf1"][l]) + f32(lp["bf1"][l]), 0.0)
        h = h + ff @ f32(lp["wf2"][l]) + f32(lp["bf2"][l])

    c = h[:, 0, :]
    dp = params["down"]
    e = jnp.maximum(c @ f32(dp["w1"]) + f32(dp["b1"]), 0.0) @ f32(dp["w2"]) + f32(dp["b2"])

    hp = params["head"]
    z = _gelu_exact(e @ f32(hp["w1"]) + f32(hp["b1"]))
    z = _gelu_exact(z @ f32(hp["w2"]) + f32(hp["b2"]))
    z = z @ f32(hp["w3"]) + f32(hp["b3"])
    z = z / jnp.maximum(jnp.linalg.norm(z, axis=-1, keepdims=True), 1e-12)
    vw = f32(hp["v"])
    w_last = vw * (f32(hp["g"]) / jnp.linalg.norm(vw, axis=0, keepdims=True))
    return z @ w_last


if __name__ == "__main__":
    # Small shapes consistent with the module (n_const x 3 particle features).
    B, S = 2, 8
    input_dim, model_dim, n_heads, dim_ff, n_layers = 3, 64, 4, 128, 2
    embed_dim, output_dim = 32, 256
    hidden_dino, bottleneck_dino = 64, 128

    key = jax.random.PRNGKey(0)
    kx, kp = jax.random.split(key)
    x = jax.random.normal(kx, (B, S, input_dim), jnp.float32)
    params = make_params(kp, input_dim=input_dim, model_dim=model_dim, n_heads=n_heads,
                         dim_feedforward=dim_ff, n_layers=n_layers, embed_dim=embed_dim,
                         output_dim=output_dim, hidden_dim_dino=hidden_dino,
                         bottleneck_dim_dino=bottleneck_dino, dtype=jnp.float32)

    # head_tn < out_dim so the streamed-V grid axis is actually exercised.
    out = transformer_encoder_forward(x, params, n_heads=n_heads, head_tn=128)
    out = jax.block_until_ready(out)
    assert out.shape == (B, output_dim)
    assert bool(jnp.all(jnp.isfinite(out)))

    with jax.default_matmul_precision("float32"):
        ref = reference_forward(x, params, n_heads=n_heads)
    max_err = float(jnp.max(jnp.abs(out - ref)))
    assert max_err < 2e-2, f"mismatch vs reference: max|diff|={max_err}"

    print("KERNEL_OK")
</pallas_src>

<mosaic_0001>
module attributes {stable_mosaic.version = 11 : i64} {
  func.func @_encoder_body_kernel(%arg0: i32, %arg1: i32, %arg2: memref<2x8x3xf32, #tpu.memory_space<vmem>>, %arg3: memref<3x64xf32, #tpu.memory_space<vmem>>, %arg4: memref<1x64xf32, #tpu.memory_space<vmem>>, %arg5: memref<1x64xf32, #tpu.memory_space<vmem>>, %arg6: memref<1x1x64xf32, #tpu.memory_space<vmem>>, %arg7: memref<1x1x64xf32, #tpu.memory_space<vmem>>, %arg8: memref<1x64x192xf32, #tpu.memory_space<vmem>>, %arg9: memref<1x1x192xf32, #tpu.memory_space<vmem>>, %arg10: memref<1x64x64xf32, #tpu.memory_space<vmem>>, %arg11: memref<1x1x64xf32, #tpu.memory_space<vmem>>, %arg12: memref<1x1x64xf32, #tpu.memory_space<vmem>>, %arg13: memref<1x1x64xf32, #tpu.memory_space<vmem>>, %arg14: memref<1x64x128xf32, #tpu.memory_space<vmem>>, %arg15: memref<1x1x128xf32, #tpu.memory_space<vmem>>, %arg16: memref<1x128x64xf32, #tpu.memory_space<vmem>>, %arg17: memref<1x1x64xf32, #tpu.memory_space<vmem>>, %arg18: memref<2x64xf32, #tpu.memory_space<vmem>>, %arg19: memref<2x16x64xf32, #tpu.memory_space<vmem>>) attributes {dimension_semantics = [#tpu.dimension_semantics<parallel>, #tpu.dimension_semantics<arbitrary>], iteration_bounds = array<i64: 1, 2>, scalar_prefetch = 0 : i64, scratch_operands = 1 : i64, tpu.core_type = #tpu.core_type<tc>, window_params = [{transform_indices = @transform_0, window_bounds = array<i64: 2, 8, 3>}, {pipeline_mode = #tpu.pipeline_mode<synchronous>, transform_indices = @transform_1, window_bounds = array<i64: 3, 64>}, {pipeline_mode = #tpu.pipeline_mode<synchronous>, transform_indices = @transform_2, window_bounds = array<i64: 1, 64>}, {pipeline_mode = #tpu.pipeline_mode<synchronous>, transform_indices = @transform_3, window_bounds = array<i64: 1, 64>}, {transform_indices = @transform_4, window_bounds = array<i64: 1, 1, 64>}, {transform_indices = @transform_5, window_bounds = array<i64: 1, 1, 64>}, {transform_indices = @transform_6, window_bounds = array<i64: 1, 64, 192>}, {transform_indices = @transform_7, window_bounds = array<i64: 1, 1, 192>}, {transform_indices = @transform_8, window_bounds = array<i64: 1, 64, 64>}, {transform_indices = @transform_9, window_bounds = array<i64: 1, 1, 64>}, {transform_indices = @transform_10, window_bounds = array<i64: 1, 1, 64>}, {transform_indices = @transform_11, window_bounds = array<i64: 1, 1, 64>}, {transform_indices = @transform_12, window_bounds = array<i64: 1, 64, 128>}, {transform_indices = @transform_13, window_bounds = array<i64: 1, 1, 128>}, {transform_indices = @transform_14, window_bounds = array<i64: 1, 128, 64>}, {transform_indices = @transform_15, window_bounds = array<i64: 1, 1, 64>}, {transform_indices = @transform_16, window_bounds = array<i64: 2, 64>}]} {
    %c0_i32 = arith.constant 0 : i32
    %0 = arith.cmpi eq, %arg1, %c0_i32 : i32
    %1 = arith.extui %0 : i1 to i32
    %c0_i32_0 = arith.constant 0 : i32
    %2 = arith.cmpi ne, %1, %c0_i32_0 : i32
    scf.if %2 {
      %c0_81 = arith.constant 0 : index
      %c0_82 = arith.constant 0 : index
      %c0_83 = arith.constant 0 : index
      %195 = vector.load %arg2[%c0_81, %c0_82, %c0_83] : memref<2x8x3xf32, #tpu.memory_space<vmem>>, vector<2x8x3xf32>
      %c0_84 = arith.constant 0 : index
      %c0_85 = arith.constant 0 : index
      %196 = vector.load %arg3[%c0_84, %c0_85] : memref<3x64xf32, #tpu.memory_space<vmem>>, vector<3x64xf32>
      %c0_86 = arith.constant 0 : index
      %c0_87 = arith.constant 0 : index
      %197 = vector.load %arg4[%c0_86, %c0_87] : memref<1x64xf32, #tpu.memory_space<vmem>>, vector<1x64xf32>
      %198 = vector.shape_cast %197 : vector<1x64xf32> to vector<1x1x64xf32>
      %199 = vector.broadcast %198 : vector<1x1x64xf32> to vector<2x8x64xf32>
      %200 = vector.extract_strided_slice %195 {offsets = [0, 0, 0], sizes = [2, 8, 1], strides = [1, 1, 1]} : vector<2x8x3xf32> to vector<2x8x1xf32>
      %201 = vector.extract_strided_slice %196 {offsets = [0, 0], sizes = [1, 64], strides = [1, 1]} : vector<3x64xf32> to vector<1x64xf32>
      %202 = vector.shape_cast %201 : vector<1x64xf32> to vector<1x1x64xf32>
      %203 = vector.broadcast %200 : vector<2x8x1xf32> to vector<2x8x64xf32>
      %204 = vector.broadcast %202 : vector<1x1x64xf32> to vector<2x8x64xf32>
      %205 = arith.mulf %203, %204 : vector<2x8x64xf32>
      %206 = arith.addf %199, %205 : vector<2x8x64xf32>
      %207 = vector.extract_strided_slice %195 {offsets = [0, 0, 1], sizes = [2, 8, 1], strides = [1, 1, 1]} : vector<2x8x3xf32> to vector<2x8x1xf32>
      %208 = vector.extract_strided_slice %196 {offsets = [1, 0], sizes = [1, 64], strides = [1, 1]} : vector<3x64xf32> to vector<1x64xf32>
      %209 = vector.shape_cast %208 : vector<1x64xf32> to vector<1x1x64xf32>
      %210 = vector.broadcast %207 : vector<2x8x1xf32> to vector<2x8x64xf32>
      %211 = vector.broadcast %209 : vector<1x1x64xf32> to vector<2x8x64xf32>
      %212 = arith.mulf %210, %211 : vector<2x8x64xf32>
      %213 = arith.addf %206, %212 : vector<2x8x64xf32>
      %214 = vector.extract_strided_slice %195 {offsets = [0, 0, 2], sizes = [2, 8, 1], strides = [1, 1, 1]} : vector<2x8x3xf32> to vector<2x8x1xf32>
      %215 = vector.extract_strided_slice %196 {offsets = [2, 0], sizes = [1, 64], strides = [1, 1]} : vector<3x64xf32> to vector<1x64xf32>
      %216 = vector.shape_cast %215 : vector<1x64xf32> to vector<1x1x64xf32>
      %217 = vector.broadcast %214 : vector<2x8x1xf32> to vector<2x8x64xf32>
      %218 = vector.broadcast %216 : vector<1x1x64xf32> to vector<2x8x64xf32>
      %219 = arith.mulf %217, %218 : vector<2x8x64xf32>
      %220 = arith.addf %213, %219 : vector<2x8x64xf32>
      %c0_88 = arith.constant 0 : index
      %c0_89 = arith.constant 0 : index
      %221 = vector.load %arg5[%c0_88, %c0_89] : memref<1x64xf32, #tpu.memory_space<vmem>>, vector<1x64xf32>
      %222 = vector.shape_cast %221 : vector<1x64xf32> to vector<1x1x64xf32>
      %223 = vector.shape_cast %222 : vector<1x1x64xf32> to vector<1x1x64xf32>
      %224 = vector.broadcast %223 : vector<1x1x64xf32> to vector<2x1x64xf32>
      %cst_90 = arith.constant 0.000000e+00 : f32
      %225 = vector.broadcast %cst_90 : f32 to vector<2x16x64xf32>
      %c0_91 = arith.constant 0 : index
      %c0_92 = arith.constant 0 : index
      %c0_93 = arith.constant 0 : index
      %226 = vector.load %arg19[%c0_91, %c0_92, %c0_93] : memref<2x16x64xf32, #tpu.memory_space<vmem>>, vector<2x16x64xf32>
      tpu.vector_store %arg19[%c0_91, %c0_92, %c0_93], %225 {strides = array<i32>} : memref<2x16x64xf32, #tpu.memory_space<vmem>>, vector<2x16x64xf32>,
      %c0_94 = arith.constant 0 : index
      %c0_95 = arith.constant 0 : index
      %c0_96 = arith.constant 0 : index
      %227 = vector.load %arg19[%c0_94, %c0_95, %c0_96] : memref<2x16x64xf32, #tpu.memory_space<vmem>>, vector<2x1x64xf32>
      tpu.vector_store %arg19[%c0_94, %c0_95, %c0_96], %224 {strides = array<i32>} : memref<2x16x64xf32, #tpu.memory_space<vmem>>, vector<2x1x64xf32>,
      %c0_97 = arith.constant 0 : index
      %c1 = arith.constant 1 : index
      %c0_98 = arith.constant 0 : index
      %228 = vector.load %arg19[%c0_97, %c1, %c0_98] : memref<2x16x64xf32, #tpu.memory_space<vmem>>, vector<2x8x64xf32>
      tpu.vector_store %arg19[%c0_97, %c1, %c0_98], %220 {strides = array<i32>} : memref<2x16x64xf32, #tpu.memory_space<vmem>>, vector<2x8x64xf32>,
    } else {
    }
    %c0 = arith.constant 0 : index
    %c0_1 = arith.constant 0 : index
    %c0_2 = arith.constant 0 : index
    %3 = vector.load %arg19[%c0, %c0_1, %c0_2] : memref<2x16x64xf32, #tpu.memory_space<vmem>>, vector<2x16x64xf32>
    %4 = vector.shape_cast %3 : vector<2x16x64xf32> to vector<32x64xf32>
    %c0_3 = arith.constant 0 : index
    %c0_4 = arith.constant 0 : index
    %c0_5 = arith.constant 0 : index
    %5 = vector.load %arg6[%c0_3, %c0_4, %c0_5] : memref<1x1x64xf32, #tpu.memory_space<vmem>>, vector<1x1x64xf32>
    %6 = vector.shape_cast %5 : vector<1x1x64xf32> to vector<1x64xf32>
    %c0_6 = arith.constant 0 : index
    %c0_7 = arith.constant 0 : index
    %c0_8 = arith.constant 0 : index
    %7 = vector.load %arg7[%c0_6, %c0_7, %c0_8] : memref<1x1x64xf32, #tpu.memory_space<vmem>>, vector<1x1x64xf32>
    %8 = vector.shape_cast %7 : vector<1x1x64xf32> to vector<1x64xf32>
    %cst = arith.constant dense<0.000000e+00> : vector<32xf32>
    %9 = vector.multi_reduction <add>, %4, %cst [1] : vector<32x64xf32> to vector<32xf32>
    %10 = vector.shape_cast %9 : vector<32xf32> to vector<32x1xf32>
    %cst_9 = arith.constant 6.400000e+01 : f32
    %11 = vector.broadcast %cst_9 : f32 to vector<32x1xf32>
    %12 = arith.divf %10, %11 : vector<32x1xf32>
    %13 = vector.broadcast %12 : vector<32x1xf32> to vector<32x64xf32>
    %14 = arith.subf %4, %13 : vector<32x64xf32>
    %15 = arith.mulf %14, %14 : vector<32x64xf32>
    %cst_10 = arith.constant dense<0.000000e+00> : vector<32xf32>
    %16 = vector.multi_reduction <add>, %15, %cst_10 [1] : vector<32x64xf32> to vector<32xf32>
    %17 = vector.shape_cast %16 : vector<32xf32> to vector<32x1xf32>
    %cst_11 = arith.constant 6.400000e+01 : f32
    %18 = vector.broadcast %cst_11 : f32 to vector<32x1xf32>
    %19 = arith.divf %17, %18 : vector<32x1xf32>
    %20 = vector.broadcast %12 : vector<32x1xf32> to vector<32x64xf32>
    %21 = arith.subf %4, %20 : vector<32x64xf32>
    %cst_12 = arith.constant 9.99999974E-6 : f32
    %22 = vector.broadcast %cst_12 : f32 to vector<32x1xf32>
    %23 = arith.addf %19, %22 : vector<32x1xf32>
    %24 = math.rsqrt %23 : vector<32x1xf32>
    %25 = vector.broadcast %24 : vector<32x1xf32> to vector<32x64xf32>
    %26 = arith.mulf %21, %25 : vector<32x64xf32>
    %27 = vector.broadcast %6 : vector<1x64xf32> to vector<32x64xf32>
    %28 = arith.mulf %26, %27 : vector<32x64xf32>
    %29 = vector.broadcast %8 : vector<1x64xf32> to vector<32x64xf32>
    %30 = arith.addf %28, %29 : vector<32x64xf32>
    %c0_13 = arith.constant 0 : index
    %c0_14 = arith.constant 0 : index
    %c0_15 = arith.constant 0 : index
    %31 = vector.load %arg8[%c0_13, %c0_14, %c0_15] : memref<1x64x192xf32, #tpu.memory_space<vmem>>, vector<1x64x192xf32>
    %32 = vector.shape_cast %31 : vector<1x64x192xf32> to vector<64x192xf32>
    %cst_16 = arith.constant dense<0.000000e+00> : vector<32x192xf32>
    %33 = tpu.matmul %30, %32, %cst_16 {dimension_numbers = #tpu.dot_dimension_numbers<[1], [0], [0], [1], [0, 0, 1, 1], [], []>} : vector<32x64xf32>, vector<64x192xf32>, vector<32x192xf32> -> vector<32x192xf32>
    %c0_17 = arith.constant 0 : index
    %c0_18 = arith.constant 0 : index
    %c0_19 = arith.constant 0 : index
    %34 = vector.load %arg9[%c0_17, %c0_18, %c0_19] : memref<1x1x192xf32, #tpu.memory_space<vmem>>, vector<1x1x192xf32>
    %35 = vector.shape_cast %34 : vector<1x1x192xf32> to vector<1x192xf32>
    %36 = vector.broadcast %35 : vector<1x192xf32> to vector<32x192xf32>
    %37 = arith.addf %33, %36 : vector<32x192xf32>
    %38 = tpu.iota {dimensions = array<i32: 2>} : vector<1x1x16xi32>
    %c9_i32 = arith.constant 9 : i32
    %39 = vector.broadcast %c9_i32 : i32 to vector<1x1x16xi32>
    %40 = arith.cmpi slt, %38, %39 : vector<1x1x16xi32>
    %41 = vector.extract_strided_slice %37 {offsets = [0, 0], sizes = [32, 16], strides = [1, 1]} : vector<32x192xf32> to vector<32x16xf32>
    %42 = vector.shape_cast %41 : vector<32x16xf32> to vector<2x16x16xf32>
    %cst_20 = arith.constant 2.500000e-01 : f32
    %43 = vector.broadcast %cst_20 : f32 to vector<2x16x16xf32>
    %44 = arith.mulf %42, %43 : vector<2x16x16xf32>
    %45 = vector.extract_strided_slice %37 {offsets = [0, 64], sizes = [32, 16], strides = [1, 1]} : vector<32x192xf32> to vector<32x16xf32>
    %46 = vector.shape_cast %45 : vector<32x16xf32> to vector<2x16x16xf32>
    %47 = vector.extract_strided_slice %37 {offsets = [0, 128], sizes = [32, 16], strides = [1, 1]} : vector<32x192xf32> to vector<32x16xf32>
    %48 = vector.shape_cast %47 : vector<32x16xf32> to vector<2x16x16xf32>
    "tpu.trace_start"() <{level = 10 : i32, message = "btd,bsd->bts"}> : () -> ()
    %cst_21 = arith.constant dense<0.000000e+00> : vector<2x16x16xf32>
    %49 = tpu.matmul %44, %46, %cst_21 {dimension_numbers = #tpu.dot_dimension_numbers<[2], [2], [1], [1], [0, 0, 0, 1, 1, 1], [0], [0]>} : vector<2x16x16xf32>, vector<2x16x16xf32>, vector<2x16x16xf32> -> vector<2x16x16xf32>
    %cst_22 = arith.constant -1.000000e+30 : f32
    "tpu.trace_stop"() : () -> ()
    %50 = vector.shape_cast %40 : vector<1x1x16xi1> to vector<1x1x16xi1>
    %51 = vector.broadcast %50 : vector<1x1x16xi1> to vector<2x16x16xi1>
    %52 = vector.broadcast %cst_22 : f32 to vector<2x16x16xf32>
    %53 = arith.select %51, %49, %52 : vector<2x16x16xi1>, vector<2x16x16xf32>
    %cst_23 = arith.constant dense<0xFF800000> : vector<2x16xf32>
    %54 = vector.multi_reduction <maximumf>, %53, %cst_23 [2] : vector<2x16x16xf32> to vector<2x16xf32>
    %55 = vector.shape_cast %54 : vector<2x16xf32> to vector<2x16x1xf32>
    %56 = vector.broadcast %55 : vector<2x16x1xf32> to vector<2x16x16xf32>
    %57 = arith.subf %53, %56 : vector<2x16x16xf32>
    %58 = math.exp %57 : vector<2x16x16xf32>
    %cst_24 = arith.constant dense<0.000000e+00> : vector<2x16xf32>
    %59 = vector.multi_reduction <add>, %58, %cst_24 [2] : vector<2x16x16xf32> to vector<2x16xf32>
    %60 = vector.shape_cast %59 : vector<2x16xf32> to vector<2x16x1xf32>
    %61 = tpu.reciprocal %60 {approx = true} : vector<2x16x1xf32> -> vector<2x16x1xf32>
    %62 = vector.broadcast %61 : vector<2x16x1xf32> to vector<2x16x16xf32>
    %63 = arith.mulf %58, %62 : vector<2x16x16xf32>
    "tpu.trace_start"() <{level = 10 : i32, message = "bts,bsd->btd"}> : () -> ()
    %cst_25 = arith.constant dense<0.000000e+00> : vector<2x16x16xf32>
    %64 = tpu.matmul %63, %48, %cst_25 {dimension_numbers = #tpu.dot_dimension_numbers<[2], [1], [1], [2], [0, 0, 0, 1, 1, 2], [0], [0]>} : vector<2x16x16xf32>, vector<2x16x16xf32>, vector<2x16x16xf32> -> vector<2x16x16xf32>
    "tpu.trace_stop"() : () -> ()
    %65 = vector.extract_strided_slice %37 {offsets = [0, 16], sizes = [32, 16], strides = [1, 1]} : vector<32x192xf32> to vector<32x16xf32>
    %66 = vector.shape_cast %65 : vector<32x16xf32> to vector<2x16x16xf32>
    %cst_26 = arith.constant 2.500000e-01 : f32
    %67 = vector.broadcast %cst_26 : f32 to vector<2x16x16xf32>
    %68 = arith.mulf %66, %67 : vector<2x16x16xf32>
    %69 = vector.extract_strided_slice %37 {offsets = [0, 80], sizes = [32, 16], strides = [1, 1]} : vector<32x192xf32> to vector<32x16xf32>
    %70 = vector.shape_cast %69 : vector<32x16xf32> to vector<2x16x16xf32>
    %71 = vector.extract_strided_slice %37 {offsets = [0, 144], sizes = [32, 16], strides = [1, 1]} : vector<32x192xf32> to vector<32x16xf32>
    %72 = vector.shape_cast %71 : vector<32x16xf32> to vector<2x16x16xf32>
    "tpu.trace_start"() <{level = 10 : i32, message = "btd,bsd->bts"}> : () -> ()
    %cst_27 = arith.constant dense<0.000000e+00> : vector<2x16x16xf32>
    %73 = tpu.matmul %68, %70, %cst_27 {dimension_numbers = #tpu.dot_dimension_numbers<[2], [2], [1], [1], [0, 0, 0, 1, 1, 1], [0], [0]>} : vector<2x16x16xf32>, vector<2x16x16xf32>, vector<2x16x16xf32> -> vector<2x16x16xf32>
    %cst_28 = arith.constant -1.000000e+30 : f32
    "tpu.trace_stop"() : () -> ()
    %74 = vector.shape_cast %40 : vector<1x1x16xi1> to vector<1x1x16xi1>
    %75 = vector.broadcast %74 : vector<1x1x16xi1> to vector<2x16x16xi1>
    %76 = vector.broadcast %cst_28 : f32 to vector<2x16x16xf32>
    %77 = arith.select %75, %73, %76 : vector<2x16x16xi1>, vector<2x16x16xf32>
    %cst_29 = arith.constant dense<0xFF800000> : vector<2x16xf32>
    %78 = vector.multi_reduction <maximumf>, %77, %cst_29 [2] : vector<2x16x16xf32> to vector<2x16xf32>
    %79 = vector.shape_cast %78 : vector<2x16xf32> to vector<2x16x1xf32>
    %80 = vector.broadcast %79 : vector<2x16x1xf32> to vector<2x16x16xf32>
    %81 = arith.subf %77, %80 : vector<2x16x16xf32>
    %82 = math.exp %81 : vector<2x16x16xf32>
    %cst_30 = arith.constant dense<0.000000e+00> : vector<2x16xf32>
    %83 = vector.multi_reduction <add>, %82, %cst_30 [2] : vector<2x16x16xf32> to vector<2x16xf32>
    %84 = vector.shape_cast %83 : vector<2x16xf32> to vector<2x16x1xf32>
    %85 = tpu.reciprocal %84 {approx = true} : vector<2x16x1xf32> -> vector<2x16x1xf32>
    %86 = vector.broadcast %85 : vector<2x16x1xf32> to vector<2x16x16xf32>
    %87 = arith.mulf %82, %86 : vector<2x16x16xf32>
    "tpu.trace_start"() <{level = 10 : i32, message = "bts,bsd->btd"}> : () -> ()
    %cst_31 = arith.constant dense<0.000000e+00> : vector<2x16x16xf32>
    %88 = tpu.matmul %87, %72, %cst_31 {dimension_numbers = #tpu.dot_dimension_numbers<[2], [1], [1], [2], [0, 0, 0, 1, 1, 2], [0], [0]>} : vector<2x16x16xf32>, vector<2x16x16xf32>, vector<2x16x16xf32> -> vector<2x16x16xf32>
    "tpu.trace_stop"() : () -> ()
    %89 = vector.extract_strided_slice %37 {offsets = [0, 32], sizes = [32, 16], strides = [1, 1]} : vector<32x192xf32> to vector<32x16xf32>
    %90 = vector.shape_cast %89 : vector<32x16xf32> to vector<2x16x16xf32>
    %cst_32 = arith.constant 2.500000e-01 : f32
    %91 = vector.broadcast %cst_32 : f32 to vector<2x16x16xf32>
    %92 = arith.mulf %90, %91 : vector<2x16x16xf32>
    %93 = vector.extract_strided_slice %37 {offsets = [0, 96], sizes = [32, 16], strides = [1, 1]} : vector<32x192xf32> to vector<32x16xf32>
    %94 = vector.shape_cast %93 : vector<32x16xf32> to vector<2x16x16xf32>
    %95 = vector.extract_strided_slice %37 {offsets = [0, 160], sizes = [32, 16], strides = [1, 1]} : vector<32x192xf32> to vector<32x16xf32>
    %96 = vector.shape_cast %95 : vector<32x16xf32> to vector<2x16x16xf32>
    "tpu.trace_start"() <{level = 10 : i32, message = "btd,bsd->bts"}> : () -> ()
    %cst_33 = arith.constant dense<0.000000e+00> : vector<2x16x16xf32>
    %97 = tpu.matmul %92, %94, %cst_33 {dimension_numbers = #tpu.dot_dimension_numbers<[2], [2], [1], [1], [0, 0, 0, 1, 1, 1], [0], [0]>} : vector<2x16x16xf32>, vector<2x16x16xf32>, vector<2x16x16xf32> -> vector<2x16x16xf32>
    %cst_34 = arith.constant -1.000000e+30 : f32
    "tpu.trace_stop"() : () -> ()
    %98 = vector.shape_cast %40 : vector<1x1x16xi1> to vector<1x1x16xi1>
    %99 = vector.broadcast %98 : vector<1x1x16xi1> to vector<2x16x16xi1>
    %100 = vector.broadcast %cst_34 : f32 to vector<2x16x16xf32>
    %101 = arith.select %99, %97, %100 : vector<2x16x16xi1>, vector<2x16x16xf32>
    %cst_35 = arith.constant dense<0xFF800000> : vector<2x16xf32>
    %102 = vector.multi_reduction <maximumf>, %101, %cst_35 [2] : vector<2x16x16xf32> to vector<2x16xf32>
    %103 = vector.shape_cast %102 : vector<2x16xf32> to vector<2x16x1xf32>
    %104 = vector.broadcast %103 : vector<2x16x1xf32> to vector<2x16x16xf32>
    %105 = arith.subf %101, %104 : vector<2x16x16xf32>
    %106 = math.exp %105 : vector<2x16x16xf32>
    %cst_36 = arith.constant dense<0.000000e+00> : vector<2x16xf32>
    %107 = vector.multi_reduction <add>, %106, %cst_36 [2] : vector<2x16x16xf32> to vector<2x16xf32>
    %108 = vector.shape_cast %107 : vector<2x16xf32> to vector<2x16x1xf32>
    %109 = tpu.reciprocal %108 {approx = true} : vector<2x16x1xf32> -> vector<2x16x1xf32>
    %110 = vector.broadcast %109 : vector<2x16x1xf32> to vector<2x16x16xf32>
    %111 = arith.mulf %106, %110 : vector<2x16x16xf32>
    "tpu.trace_start"() <{level = 10 : i32, message = "bts,bsd->btd"}> : () -> ()
    %cst_37 = arith.constant dense<0.000000e+00> : vector<2x16x16xf32>
    %112 = tpu.matmul %111, %96, %cst_37 {dimension_numbers = #tpu.dot_dimension_numbers<[2], [1], [1], [2], [0, 0, 0, 1, 1, 2], [0], [0]>} : vector<2x16x16xf32>, vector<2x16x16xf32>, vector<2x16x16xf32> -> vector<2x16x16xf32>
    "tpu.trace_stop"() : () -> ()
    %113 = vector.extract_strided_slice %37 {offsets = [0, 48], sizes = [32, 16], strides = [1, 1]} : vector<32x192xf32> to vector<32x16xf32>
    %114 = vector.shape_cast %113 : vector<32x16xf32> to vector<2x16x16xf32>
    %cst_38 = arith.constant 2.500000e-01 : f32
    %115 = vector.broadcast %cst_38 : f32 to vector<2x16x16xf32>
    %116 = arith.mulf %114, %115 : vector<2x16x16xf32>
    %117 = vector.extract_strided_slice %37 {offsets = [0, 112], sizes = [32, 16], strides = [1, 1]} : vector<32x192xf32> to vector<32x16xf32>
    %118 = vector.shape_cast %117 : vector<32x16xf32> to vector<2x16x16xf32>
    %119 = vector.extract_strided_slice %37 {offsets = [0, 176], sizes = [32, 16], strides = [1, 1]} : vector<32x192xf32> to vector<32x16xf32>
    %120 = vector.shape_cast %119 : vector<32x16xf32> to vector<2x16x16xf32>
    "tpu.trace_start"() <{level = 10 : i32, message = "btd,bsd->bts"}> : () -> ()
    %cst_39 = arith.constant dense<0.000000e+00> : vector<2x16x16xf32>
    %121 = tpu.matmul %116, %118, %cst_39 {dimension_numbers = #tpu.dot_dimension_numbers<[2], [2], [1], [1], [0, 0, 0, 1, 1, 1], [0], [0]>} : vector<2x16x16xf32>, vector<2x16x16xf32>, vector<2x16x16xf32> -> vector<2x16x16xf32>
    %cst_40 = arith.constant -1.000000e+30 : f32
    "tpu.trace_stop"() : () -> ()
    %122 = vector.shape_cast %40 : vector<1x1x16xi1> to vector<1x1x16xi1>
    %123 = vector.broadcast %122 : vector<1x1x16xi1> to vector<2x16x16xi1>
    %124 = vector.broadcast %cst_40 : f32 to vector<2x16x16xf32>
    %125 = arith.select %123, %121, %124 : vector<2x16x16xi1>, vector<2x16x16xf32>
    %cst_41 = arith.constant dense<0xFF800000> : vector<2x16xf32>
    %126 = vector.multi_reduction <maximumf>, %125, %cst_41 [2] : vector<2x16x16xf32> to vector<2x16xf32>
    %127 = vector.shape_cast %126 : vector<2x16xf32> to vector<2x16x1xf32>
    %128 = vector.broadcast %127 : vector<2x16x1xf32> to vector<2x16x16xf32>
    %129 = arith.subf %125, %128 : vector<2x16x16xf32>
    %130 = math.exp %129 : vector<2x16x16xf32>
    %cst_42 = arith.constant dense<0.000000e+00> : vector<2x16xf32>
    %131 = vector.multi_reduction <add>, %130, %cst_42 [2] : vector<2x16x16xf32> to vector<2x16xf32>
    %132 = vector.shape_cast %131 : vector<2x16xf32> to vector<2x16x1xf32>
    %133 = tpu.reciprocal %132 {approx = true} : vector<2x16x1xf32> -> vector<2x16x1xf32>
    %134 = vector.broadcast %133 : vector<2x16x1xf32> to vector<2x16x16xf32>
    %135 = arith.mulf %130, %134 : vector<2x16x16xf32>
    "tpu.trace_start"() <{level = 10 : i32, message = "bts,bsd->btd"}> : () -> ()
    %cst_43 = arith.constant dense<0.000000e+00> : vector<2x16x16xf32>
    %136 = tpu.matmul %135, %120, %cst_43 {dimension_numbers = #tpu.dot_dimension_numbers<[2], [1], [1], [2], [0, 0, 0, 1, 1, 2], [0], [0]>} : vector<2x16x16xf32>, vector<2x16x16xf32>, vector<2x16x16xf32> -> vector<2x16x16xf32>
    "tpu.trace_stop"() : () -> ()
    %137 = tpu.concatenate %64, %88, %112, %136 in 2 : vector<2x16x16xf32>, vector<2x16x16xf32>, vector<2x16x16xf32>, vector<2x16x16xf32> -> vector<2x16x64xf32>
    %138 = vector.shape_cast %137 : vector<2x16x64xf32> to vector<32x64xf32>
    %c0_44 = arith.constant 0 : index
    %c0_45 = arith.constant 0 : index
    %c0_46 = arith.constant 0 : index
    %139 = vector.load %arg10[%c0_44, %c0_45, %c0_46] : memref<1x64x64xf32, #tpu.memory_space<vmem>>, vector<1x64x64xf32>
    %140 = vector.shape_cast %139 : vector<1x64x64xf32> to vector<64x64xf32>
    %cst_47 = arith.constant dense<0.000000e+00> : vector<32x64xf32>
    %141 = tpu.matmul %138, %140, %cst_47 {dimension_numbers = #tpu.dot_dimension_numbers<[1], [0], [0], [1], [0, 0, 1, 1], [], []>} : vector<32x64xf32>, vector<64x64xf32>, vector<32x64xf32> -> vector<32x64xf32>
    %142 = arith.addf %4, %141 : vector<32x64xf32>
    %c0_48 = arith.constant 0 : index
    %c0_49 = arith.constant 0 : index
    %c0_50 = arith.constant 0 : index
    %143 = vector.load %arg11[%c0_48, %c0_49, %c0_50] : memref<1x1x64xf32, #tpu.memory_space<vmem>>, vector<1x1x64xf32>
    %144 = vector.shape_cast %143 : vector<1x1x64xf32> to vector<1x64xf32>
    %145 = vector.broadcast %144 : vector<1x64xf32> to vector<32x64xf32>
    %146 = arith.addf %142, %145 : vector<32x64xf32>
    %c0_51 = arith.constant 0 : index
    %c0_52 = arith.constant 0 : index
    %c0_53 = arith.constant 0 : index
    %147 = vector.load %arg12[%c0_51, %c0_52, %c0_53] : memref<1x1x64xf32, #tpu.memory_space<vmem>>, vector<1x1x64xf32>
    %148 = vector.shape_cast %147 : vector<1x1x64xf32> to vector<1x64xf32>
    %c0_54 = arith.constant 0 : index
    %c0_55 = arith.constant 0 : index
    %c0_56 = arith.constant 0 : index
    %149 = vector.load %arg13[%c0_54, %c0_55, %c0_56] : memref<1x1x64xf32, #tpu.memory_space<vmem>>, vector<1x1x64xf32>
    %150 = vector.shape_cast %149 : vector<1x1x64xf32> to vector<1x64xf32>
    %cst_57 = arith.constant dense<0.000000e+00> : vector<32xf32>
    %151 = vector.multi_reduction <add>, %146, %cst_57 [1] : vector<32x64xf32> to vector<32xf32>
    %152 = vector.shape_cast %151 : vector<32xf32> to vector<32x1xf32>
    %cst_58 = arith.constant 6.400000e+01 : f32
    %153 = vector.broadcast %cst_58 : f32 to vector<32x1xf32>
    %154 = arith.divf %152, %153 : vector<32x1xf32>
    %155 = vector.broadcast %154 : vector<32x1xf32> to vector<32x64xf32>
    %156 = arith.subf %146, %155 : vector<32x64xf32>
    %157 = arith.mulf %156, %156 : vector<32x64xf32>
    %cst_59 = arith.constant dense<0.000000e+00> : vector<32xf32>
    %158 = vector.multi_reduction <add>, %157, %cst_59 [1] : vector<32x64xf32> to vector<32xf32>
    %159 = vector.shape_cast %158 : vector<32xf32> to vector<32x1xf32>
    %cst_60 = arith.constant 6.400000e+01 : f32
    %160 = vector.broadcast %cst_60 : f32 to vector<32x1xf32>
    %161 = arith.divf %159, %160 : vector<32x1xf32>
    %162 = vector.broadcast %154 : vector<32x1xf32> to vector<32x64xf32>
    %163 = arith.subf %146, %162 : vector<32x64xf32>
    %cst_61 = arith.constant 9.99999974E-6 : f32
    %164 = vector.broadcast %cst_61 : f32 to vector<32x1xf32>
    %165 = arith.addf %161, %164 : vector<32x1xf32>
    %166 = math.rsqrt %165 : vector<32x1xf32>
    %167 = vector.broadcast %166 : vector<32x1xf32> to vector<32x64xf32>
    %168 = arith.mulf %163, %167 : vector<32x64xf32>
    %169 = vector.broadcast %148 : vector<1x64xf32> to vector<32x64xf32>
    %170 = arith.mulf %168, %169 : vector<32x64xf32>
    %171 = vector.broadcast %150 : vector<1x64xf32> to vector<32x64xf32>
    %172 = arith.addf %170, %171 : vector<32x64xf32>
    %c0_62 = arith.constant 0 : index
    %c0_63 = arith.constant 0 : index
    %c0_64 = arith.constant 0 : index
    %173 = vector.load %arg14[%c0_62, %c0_63, %c0_64] : memref<1x64x128xf32, #tpu.memory_space<vmem>>, vector<1x64x128xf32>
    %174 = vector.shape_cast %173 : vector<1x64x128xf32> to vector<64x128xf32>
    %cst_65 = arith.constant dense<0.000000e+00> : vector<32x128xf32>
    %175 = tpu.matmul %172, %174, %cst_65 {dimension_numbers = #tpu.dot_dimension_numbers<[1], [0], [0], [1], [0, 0, 1, 1], [], []>} : vector<32x64xf32>, vector<64x128xf32>, vector<32x128xf32> -> vector<32x128xf32>
    %c0_66 = arith.constant 0 : index
    %c0_67 = arith.constant 0 : index
    %c0_68 = arith.constant 0 : index
    %176 = vector.load %arg15[%c0_66, %c0_67, %c0_68] : memref<1x1x128xf32, #tpu.memory_space<vmem>>, vector<1x1x128xf32>
    %177 = vector.shape_cast %176 : vector<1x1x128xf32> to vector<1x128xf32>
    %178 = vector.broadcast %177 : vector<1x128xf32> to vector<32x128xf32>
    %179 = arith.addf %175, %178 : vector<32x128xf32>
    %cst_69 = arith.constant 0.000000e+00 : f32
    %180 = vector.broadcast %cst_69 : f32 to vector<32x128xf32>
    %181 = arith.maximumf %179, %180 : vector<32x128xf32>
    %c0_70 = arith.constant 0 : index
    %c0_71 = arith.constant 0 : index
    %c0_72 = arith.constant 0 : index
    %182 = vector.load %arg16[%c0_70, %c0_71, %c0_72] : memref<1x128x64xf32, #tpu.memory_space<vmem>>, vector<1x128x64xf32>
    %183 = vector.shape_cast %182 : vector<1x128x64xf32> to vector<128x64xf32>
    %cst_73 = arith.constant dense<0.000000e+00> : vector<32x64xf32>
    %184 = tpu.matmul %181, %183, %cst_73 {dimension_numbers = #tpu.dot_dimension_numbers<[1], [0], [0], [1], [0, 0, 1, 1], [], []>} : vector<32x128xf32>, vector<128x64xf32>, vector<32x64xf32> -> vector<32x64xf32>
    %c0_74 = arith.constant 0 : index
    %c0_75 = arith.constant 0 : index
    %c0_76 = arith.constant 0 : index
    %185 = vector.load %arg17[%c0_74, %c0_75, %c0_76] : memref<1x1x64xf32, #tpu.memory_space<vmem>>, vector<1x1x64xf32>
    %186 = vector.shape_cast %185 : vector<1x1x64xf32> to vector<1x64xf32>
    %187 = vector.broadcast %186 : vector<1x64xf32> to vector<32x64xf32>
    %188 = arith.addf %184, %187 : vector<32x64xf32>
    %189 = arith.addf %146, %188 : vector<32x64xf32>
    %190 = vector.shape_cast %189 : vector<32x64xf32> to vector<2x16x64xf32>
    %c0_77 = arith.constant 0 : index
    %c0_78 = arith.constant 0 : index
    %c0_79 = arith.constant 0 : index
    %191 = vector.load %arg19[%c0_77, %c0_78, %c0_79] : memref<2x16x64xf32, #tpu.memory_space<vmem>>, vector<2x16x64xf32>
    tpu.vector_store %arg19[%c0_77, %c0_78, %c0_79], %190 {strides = array<i32>} : memref<2x16x64xf32, #tpu.memory_space<vmem>>, vector<2x16x64xf32>,
    %c1_i32 = arith.constant 1 : i32
    %192 = arith.cmpi eq, %arg1, %c1_i32 : i32
    %193 = arith.extui %192 : i1 to i32
    %c0_i32_80 = arith.constant 0 : i32
    %194 = arith.cmpi ne, %193, %c0_i32_80 : i32
    scf.if %194 {
      %195 = vector.extract_strided_slice %190 {offsets = [0, 0, 0], sizes = [2, 1, 64], strides = [1, 1, 1]} : vector<2x16x64xf32> to vector<2x1x64xf32>
      %196 = vector.shape_cast %195 : vector<2x1x64xf32> to vector<2x64xf32>
      %c0_81 = arith.constant 0 : index
      %c0_82 = arith.constant 0 : index
      %197 = vector.load %arg18[%c0_81, %c0_82] : memref<2x64xf32, #tpu.memory_space<vmem>>, vector<2x64xf32>
      tpu.vector_store %arg18[%c0_81, %c0_82], %196 {strides = array<i32>} : memref<2x64xf32, #tpu.memory_space<vmem>>, vector<2x64xf32>,
    } else {
    }
    return
  }
  func.func @transform_0(%arg0: i32, %arg1: i32) -> (i32, i32, i32) {
    %c0_i32 = arith.constant 0 : i32
    %c0_i32_0 = arith.constant 0 : i32
    %c0_i32_1 = arith.constant 0 : i32
    return %arg0, %c0_i32, %c0_i32_0 : i32, i32, i32
  }
  func.func @transform_1(%arg0: i32, %arg1: i32) -> (i32, i32) {
    %c0_i32 = arith.constant 0 : i32
    %c0_i32_0 = arith.constant 0 : i32
    %c0_i32_1 = arith.constant 0 : i32
    return %c0_i32, %c0_i32_0 : i32, i32
  }
  func.func @transform_2(%arg0: i32, %arg1: i32) -> (i32, i32) {
    %c0_i32 = arith.constant 0 : i32
    %c0_i32_0 = arith.constant 0 : i32
    %c0_i32_1 = arith.constant 0 : i32
    return %c0_i32, %c0_i32_0 : i32, i32
  }
  func.func @transform_3(%arg0: i32, %arg1: i32) -> (i32, i32) {
    %c0_i32 = arith.constant 0 : i32
    %c0_i32_0 = arith.constant 0 : i32
    %c0_i32_1 = arith.constant 0 : i32
    return %c0_i32, %c0_i32_0 : i32, i32
  }
  func.func @transform_4(%arg0: i32, %arg1: i32) -> (i32, i32, i32) {
    %c0_i32 = arith.constant 0 : i32
    %c0_i32_0 = arith.constant 0 : i32
    %c0_i32_1 = arith.constant 0 : i32
    return %arg1, %c0_i32, %c0_i32_0 : i32, i32, i32
  }
  func.func @transform_5(%arg0: i32, %arg1: i32) -> (i32, i32, i32) {
    %c0_i32 = arith.constant 0 : i32
    %c0_i32_0 = arith.constant 0 : i32
    %c0_i32_1 = arith.constant 0 : i32
    return %arg1, %c0_i32, %c0_i32_0 : i32, i32, i32
  }
  func.func @transform_6(%arg0: i32, %arg1: i32) -> (i32, i32, i32) {
    %c0_i32 = arith.constant 0 : i32
    %c0_i32_0 = arith.constant 0 : i32
    %c0_i32_1 = arith.constant 0 : i32
    return %arg1, %c0_i32, %c0_i32_0 : i32, i32, i32
  }
  func.func @transform_7(%arg0: i32, %arg1: i32) -> (i32, i32, i32) {
    %c0_i32 = arith.constant 0 : i32
    %c0_i32_0 = arith.constant 0 : i32
    %c0_i32_1 = arith.constant 0 : i32
    return %arg1, %c0_i32, %c0_i32_0 : i32, i32, i32
  }
  func.func @transform_8(%arg0: i32, %arg1: i32) -> (i32, i32, i32) {
    %c0_i32 = arith.constant 0 : i32
    %c0_i32_0 = arith.constant 0 : i32
    %c0_i32_1 = arith.constant 0 : i32
    return %arg1, %c0_i32, %c0_i32_0 : i32, i32, i32
  }
  func.func @transform_9(%arg0: i32, %arg1: i32) -> (i32, i32, i32) {
    %c0_i32 = arith.constant 0 : i32
    %c0_i32_0 = arith.constant 0 : i32
    %c0_i32_1 = arith.constant 0 : i32
    return %arg1, %c0_i32, %c0_i32_0 : i32, i32, i32
  }
  func.func @transform_10(%arg0: i32, %arg1: i32) -> (i32, i32, i32) {
    %c0_i32 = arith.constant 0 : i32
    %c0_i32_0 = arith.constant 0 : i32
    %c0_i32_1 = arith.constant 0 : i32
    return %arg1, %c0_i32, %c0_i32_0 : i32, i32, i32
  }
  func.func @transform_11(%arg0: i32, %arg1: i32) -> (i32, i32, i32) {
    %c0_i32 = arith.constant 0 : i32
    %c0_i32_0 = arith.constant 0 : i32
    %c0_i32_1 = arith.constant 0 : i32
    return %arg1, %c0_i32, %c0_i32_0 : i32, i32, i32
  }
  func.func @transform_12(%arg0: i32, %arg1: i32) -> (i32, i32, i32) {
    %c0_i32 = arith.constant 0 : i32
    %c0_i32_0 = arith.constant 0 : i32
    %c0_i32_1 = arith.constant 0 : i32
    return %arg1, %c0_i32, %c0_i32_0 : i32, i32, i32
  }
  func.func @transform_13(%arg0: i32, %arg1: i32) -> (i32, i32, i32) {
    %c0_i32 = arith.constant 0 : i32
    %c0_i32_0 = arith.constant 0 : i32
    %c0_i32_1 = arith.constant 0 : i32
    return %arg1, %c0_i32, %c0_i32_0 : i32, i32, i32
  }
  func.func @transform_14(%arg0: i32, %arg1: i32) -> (i32, i32, i32) {
    %c0_i32 = arith.constant 0 : i32
    %c0_i32_0 = arith.constant 0 : i32
    %c0_i32_1 = arith.constant 0 : i32
    return %arg1, %c0_i32, %c0_i32_0 : i32, i32, i32
  }
  func.func @transform_15(%arg0: i32, %arg1: i32) -> (i32, i32, i32) {
    %c0_i32 = arith.constant 0 : i32
    %c0_i32_0 = arith.constant 0 : i32
    %c0_i32_1 = arith.constant 0 : i32
    return %arg1, %c0_i32, %c0_i32_0 : i32, i32, i32
  }
  func.func @transform_16(%arg0: i32, %arg1: i32) -> (i32, i32) {
    %c0_i32 = arith.constant 0 : i32
    %c0_i32_0 = arith.constant 0 : i32
    return %arg0, %c0_i32 : i32, i32
  }
}

</mosaic_0001>

<bundles_post_ra>
// kernel: tpu_custom_call.1
= control target key start
LH: loop header
LB: loop body
LE: loop exit
PB: predicated region body
PF: predicated region fallthrough
CT: control target
= control target key end

     0   :  { %s4776_s0 = inlined_call_operand.vmem [shape: f32[2,8,3], index: 0, kind: input, shape index: {}]   ;;  %s4777_s1 = inlined_call_operand.vmem [shape: f32[3,64], index: 1, kind: input, shape index: {}]   ;;  %s4778_s2 = inlined_call_operand.vmem [shape: f32[1,64], index: 2, kind: input, shape index: {}]   ;;  %s4779_s3 = inlined_call_operand.vmem [shape: f32[1,64], index: 3, kind: input, shape index: {}]   ;;  %s4780_s4 = inlined_call_operand.vmem [shape: f32[2,1,64], index: 4, kind: input, shape index: {}]   ;;  %s4781_s5 = inlined_call_operand.vmem [shape: f32[2,1,64], index: 5, kind: input, shape index: {}]   ;;  %s4782_s6 = inlined_call_operand.vmem [shape: f32[2,64,192], index: 6, kind: input, shape index: {}]   ;;  %s4783_s7 = inlined_call_operand.vmem [shape: f32[2,1,192], index: 7, kind: input, shape index: {}]   ;;  %s4784_s8 = inlined_call_operand.vmem [shape: f32[2,64,64], index: 8, kind: input, shape index: {}]   ;;  %s4785_s9 = inlined_call_operand.vmem [shape: f32[2,1,64], index: 9, kind: input, shape index: {}]   ;;  %s4786_s10 = inlined_call_operand.vmem [shape: f32[2,1,64], index: 10, kind: input, shape index: {}]   ;;  %s4787_s11 = inlined_call_operand.vmem [shape: f32[2,1,64], index: 11, kind: input, shape index: {}]   ;;  %s4788_s12 = inlined_call_operand.hbm [shape: f32[2,64,128], index: 12, kind: input, shape index: {}]   ;;  %s4789_s13 = inlined_call_operand.vmem [shape: f32[2,1,128], index: 13, kind: input, shape index: {}]   ;;  %s4790_s14 = inlined_call_operand.vmem [shape: f32[2,128,64], index: 14, kind: input, shape index: {}]   ;;  %s4791_s15 = inlined_call_operand.vmem [shape: f32[2,1,64], index: 15, kind: input, shape index: {}]   ;;  %s4792_s16 = inlined_call_operand.hbm [shape: f32[2,64], index: 16, kind: output, shape index: {}]  }
   0x1   :  { %4800 = sst [smem:[#allocation15_spill]] %s4776_s0 }
   0x2   :  { %4801 = sst [smem:[#allocation16_spill]] %s4777_s1 }
   0x3   :  { %4802 = sst [smem:[#allocation17_spill]] %s4778_s2 }
   0x4   :  { %4803 = sst [smem:[#allocation18_spill]] %s4779_s3 }
   0x5   :  { %4804 = sst [smem:[#allocation19_spill]] %s4782_s6 }
   0x6   :  { %4805 = sst [smem:[#allocation20_spill]] %s4783_s7 }
   0x7   :  { %4806 = sst [smem:[#allocation21_spill]] %s4788_s12 }
   0x8   :  { %4807 = sst [smem:[#allocation22_spill]] %s4791_s15 }
   0x9   :  { %4808 = sst [smem:[#allocation23_spill]] %s4792_s16 }
   0xa   :  { %21 = vsyncpa [#allocation4], 0 }
   0xb   :  { %23 = vsyncpa [#allocation4 + $0x1], 0 }
   0xc   :  { %24 = vsyncpa [#allocation5], 0  ;;  %s4109_s21 = smov 0   ;;  %s4111_s22 = smov 0  }
   0xd   :  { %s4113_s23 = smov 0   ;;  %s4115_s24 = smov 0  }
   0xe   :  { %s4117_s25 = smov 0   ;;  %s4119_s26 = smov 0  }
   0xf LB: > { %4809 = sst [smem:[#allocation9_spill]] %s3990_s22  ;;  %s4794_s27 = sadd.s32 4294967295, %s4006_s26   ;;  %s4006_s26 = sphi %s4119_s26, %s30_s26   ;;  %s4002_s25 = sphi %s4117_s25, %s4839_s25   ;;  %s3998_s24 = sphi %s4115_s24, %s4838_s24   ;;  %s3994_s23 = sphi %s4113_s23, %s4837_s23   ;;  %s3990_s22 = sphi %s4111_s22, %s4836_s22   ;;  %s3986_s21 = sphi %s4109_s21, %s4835_s21  }
  0x10   : > { %4810 = sst [smem:[#allocation10_spill]] %s3994_s23  ;;  %s39_s28 = sadd.s32 1, %s4002_s25 }
  0x11   : > { %4811 = sst [smem:[#allocation11_spill]] %s4002_s25  ;;  %p40_p0 = scmp.ge.s32.totalorder %s39_s28, 2 }
  0x12   : > { %4812 = sst [smem:[#allocation12_spill]] %s4006_s26  ;;  %s346_s29 = sadd.s32 1, %s3994_s23 }
  0x13   : > { %p353_p1 = scmp.ne.s32.totalorder %s3994_s23, %s3990_s22  ;;  %p354_p2 = scmp.eq.s32.totalorder %s4006_s26, 0 }
  0x14   : > { %s4841_s28 = smov (%p40_p0, %s39_s28), 0  ;;  %p359_p4 = scmp.ne.s32.totalorder %s3990_s22, %s3986_s21 }
  0x15   : > { %4813 = sst [smem:[#allocation13_spill]] %s4841_s28  ;;  %p4145_p3 = por %p354_p2, %p353_p1 }
  0x16   : > { %s343_s0 = ssub.s32 %s4002_s25, %s4841_s28  ;;  %p360_p5 = scmp.eq.s32.totalorder %s4794_s27, 0 }
  0x17   : > { %p344_p6 = scmp.eq.s32.totalorder %s343_s0, 0  ;;  %p3746_p8 = scmp.lt.s32.totalorder %s4006_s26, 2 }
  0x18   : > { %p4154_p7 = por %p360_p5, %p359_p4  ;;  %s558_s19 = sand.u32 1, %s3994_s23  }
  0x19   : > { %s4160_s18 = scalar_select %p344_p6, %s3994_s23, %s346_s29  }
  0x1a   : > { %s3430_s20 = sshll.u32 %s4002_s25, 10  ;;  %s3344_s16 = sshll.u32 %s558_s19, 6 }
  0x1b   : > { %4816 = sst [smem:[#allocation14_spill]] %s4160_s18  ;;  %s562_s15 = scalar_lea.vmem [#allocation3], %s3344_s16 }
  0x1c   : > { %s4817_s12 = sld [smem:[#allocation21_spill]]  ;;  %s569_s21 = sshll.u32 %s562_s15, 4  ;;  %s570_s21 = int_to_ptr.vmem [resolvable:$true] %s569_s21 }
  0x1d   : > { %p4169_p9 = pnand %p3746_p8, %p4145_p3  ;;  %s559_s0 = scalar_lea.sflag [#allocation4], %s558_s19 }
  0x1e   : > { %s3913_s29 = scalar_lea.vmem %s570_s21, 1024  ;;  %s4008_s28 = smov [#allocation3]  }
  0x1f   : > { %p3902_p10 = pneg %p4169_p9  ;;  %p3914_p11 = scmp.ne.s32.totalorder %s570_s21, %s3913_s29 }
  0x20   : > { %s3918_s25 = sshll.u32 %s4008_s28, 4  ;;  %s3919_s25 = int_to_ptr.vmem [resolvable:$false] %s3918_s25 }
  0x21   : > { %p3916_p12 = pnand %p3914_p11, %p3902_p10  ;;  %s3920_s1 = scalar_lea.vmem %s3919_s25, 2048 }
  0x22   : > { %s568_s3 = scalar_lea.hbm %s4817_s12, %s3430_s20  ;;  %p3921_p0 = scmp.lt.s32.totalorder %s570_s21, %s3919_s25 }
  0x23   : > { %p3917_p13 = pneg %p3916_p12  ;;  %p3922_p1 = scmp.lt.s32.totalorder %s3920_s1, %s3913_s29 }
  0x25   : > { %p3923_p2 = por %p3922_p1, %p3921_p0 }
  0x27   : > { %p3924_p3 = pnand %p3923_p2, %p3917_p13 }
  0x29   : > { %3927 = shalt.err (!%p3924_p3)
}
  0x2a   : > { %s4009_s2 = smov 128   ;;  %s4010_s15 = smov 8  }
  0x2b   : > { %3745 = dma.hbm_to_vmem [thread:$0]  (!%p4169_p9), %s568_s3, 1024, %s570_s21, %s559_s0, %s4009_s2, %s4009_s2, %s4010_s15  }
  0x2c   : > { %p3347_p4 = scmp.ge.s32.totalorder %s4006_s26, 1  ;;  %p597_p5 = scmp.lt.s32.totalorder %s4006_s26, 3 }
  0x2e   : > { %p598_p6 = pnand %p3347_p4, %p597_p5 }
  0x2f   : > { %s603_s16 = sand.u32 (!%p598_p6), 1, %s3990_s22  }
  0x30   : > { %601 = sbr.rel (%p598_p6) target bundleno = 4256 (0x10a0), region = 84  ;;  %s3348_s28 = sshll.u32 (!%p598_p6), %s603_s16, 6 }
  0x31   : > { %s604_s25 = scalar_lea.sflag (!%p598_p6), [#allocation4], %s603_s16  ;;  %s4180_s30 = scalar_lea.vmem (!%p598_p6), [#allocation3], %s3348_s28 }
  0x35   : > { %3977 = dma.done.wait (%p4154_p7), %s604_s25, 1024  }
  0x36   : > { %3979 = vsyncadd (%p4154_p7), %s604_s25, 4294966272  ;;  %p702_p8 = scmp.lt.s32.totalorder %s3998_s24, 1  ;;  %s4819_s6 = sld [smem:[#allocation19_spill]] }
  0x37   : > { %s4820_s7 = sld [smem:[#allocation20_spill]]  ;;  %p3356_p7 = scmp.ne.s32.totalorder %s3998_s24, 0 }
  0x38   : > { %s4188_s3 = scalar_select %p702_p8, %s3998_s24, 1 }
  0x39   : > { %s4821_s20 = sld [smem:[#allocation22_spill]] }
  0x3a   : > { %s3431_s29 = sshll.u32 %s4188_s3, 7  ;;  %s3351_s1 = sshll.u32 %s4188_s3, 1 }
  0x3b   : > { %s3432_s19 = sshll.u32 %s4188_s3, 6  ;;  %s727_s2 = scalar_lea.vmem %s4786_s10, %s4188_s3 }
  0x3c   : > { %s4203_s16 = scalar_lea.vmem %s4819_s6, %s3431_s29  ;;  %s4218_s21 = scalar_lea.vmem %s4784_s8, %s3432_s19 }
  0x3d   : > { %s4208_s27 = scalar_lea.vmem %s4820_s7, %s3351_s1  ;;  %s730_s28 = scalar_lea.vmem %s4787_s11, %s4188_s3 }
  0x3e   : > { %s733_s7 = scalar_lea.vmem %s4789_s13, %s4188_s3  ;;  %s4235_s18 = scalar_lea.vmem %s4790_s14, %s3431_s29 }
  0x3f   : > { %s741_s17 = scalar_lea.vmem %s4821_s20, %s4188_s3  ;;  %745 = sbr.rel (%p3356_p7) target bundleno = 209 (0xd1), region = 92 }
  0x40   : > { %s4822_s6 = sld [smem:[#allocation15_spill]] (!%p3356_p7) }
  0x41   : > { %s4823_s25 = sld [smem:[#allocation18_spill]] (!%p3356_p7) }
  0x42   : > { %s4824_s19 = sld [smem:[#allocation16_spill]] (!%p3356_p7) }
  0x43   : > { %s4825_s0 = sld [smem:[#allocation17_spill]] (!%p3356_p7) }
  0x44   : > { %v4011_v1 = vmov 1   ;;  %v4012_v2 = vmov 0   ;;  %vm807_vm0 = vcmask 523264   ;;  %vm812_vm1 = vcmask 516096  }
  0x45   : > { %3813 = vset.pattern.permute.xlu1 %v4011_v1  ;;  %3812 = vset.pattern.permute.xlu0 %v4012_v2  ;;  %v4013_v5 = vmov 0.0   ;;  %v4014_v6 = vmov 2   ;;  %v766_v7 = vlaneseq }
  0x46   : > { %v746_v0 = vld [vmem:[%s4822_s6] sm:$0xff]  ;;  %v747_v3 = vld [vmem:[%s4822_s6 + $0x8] sm:$0xff]  ;;  %810 = vst.msk [vmem:[#allocation2 + $0x10] sm:$0xff] %vm807_vm0, %v4013_v5  ;;  %811 = vst.msk [vmem:[#allocation2 + $0x18] sm:$0xff] %vm807_vm0, %v4013_v5 }
  0x47   : > { %775 = vperm.xlu1 %3813, %v746_v0   ;;  %758 = vperm.xlu0 %3812, %v746_v0   ;;  %v806_v4 = vld [vmem:[%s4823_s25] sm:$0x1]  ;;  %808 = vst.msk [vmem:[#allocation2] sm:$0xff] %vm807_vm0, %v4013_v5  ;;  %809 = vst.msk [vmem:[#allocation2 + $0x8] sm:$0xff] %vm807_vm0, %v4013_v5  ;;  %v767_v8 = vshrl.u32 %v766_v7, 7 }
  0x48   : > { %814 = vst.msk [vmem:[#allocation2 + $0x10] sm:$0x1] %vm812_vm1, %v806_v4  ;;  %813 = vst.msk [vmem:[#allocation2] sm:$0x1] %vm812_vm1, %v806_v4  ;;  %v748_v10 = vld [vmem:[%s4824_s19] sm:$0x7] }
  0x49   : > { %v768_v9 = vsub.s32 0, %v767_v8  ;;  %v784_v12 = vsub.s32 1, %v767_v8  ;;  %v800_v16 = vsub.s32 2, %v767_v8  ;;  %v3357_v17 = vld [vmem:[%s4825_s0] ss:$0 sm:$0xff] }
  0x4b   : > { %779 = vperm.xlu1 %3813, %v747_v3   ;;  %763 = vperm.xlu0 %3812, %v747_v3   ;;  %v769_v11 = vrot.slane %v748_v10, %v768_v9  ;;  %v785_v18 = vrot.slane %v748_v10, %v784_v12  ;;  %v801_v23 = vrot.slane %v748_v10, %v800_v16 }
  0x4f   : > { %3815 = vset.pattern.permute.xlu1 %v4014_v6  ;;  %3814 = vset.pattern.permute.xlu0 %v4014_v6 }
  0x50   : > { %795 = vperm.xlu1 %3815, %v747_v3   ;;  %791 = vperm.xlu0 %3814, %v746_v0  }
  0xc2   : > { %v776_v13 = vpop.permute.xlu1 %775  ;;  %v759_v14 = vpop.permute.xlu0 %758 }
  0xc3   : > { %v770_v15 = vmul.f32 %v769_v11, %v759_v14  ;;  %v786_v26 = vmul.f32 %v785_v18, %v776_v13 }
  0xc5   : > { %v772_v22 = vadd.f32 %v3357_v17, %v770_v15 }
  0xc6   : > { %v780_v19 = vpop.permute.xlu1 %779  ;;  %v764_v20 = vpop.permute.xlu0 %763 }
  0xc7   : > { %v771_v21 = vmul.f32 %v769_v11, %v764_v20  ;;  %v787_v24 = vmul.f32 %v785_v18, %v780_v19  ;;  %v788_v31 = vadd.f32 %v786_v26, %v772_v22 }
  0xc9   : > { %v773_v25 = vadd.f32 %v3357_v17, %v771_v21 }
  0xcb   : > { %v796_v27 = vpop.permute.xlu1 %795  ;;  %v789_v28 = vadd.f32 %v787_v24, %v773_v25  ;;  %v792_v29 = vpop.permute.xlu0 %791 }
  0xcc   : > { %v803_v30 = vmul.f32 %v801_v23, %v796_v27  ;;  %v802_v32 = vmul.f32 %v801_v23, %v792_v29 }
  0xce   : > { %v805_v33 = vadd.f32 %v803_v30, %v789_v28  ;;  %v804_v34 = vadd.f32 %v802_v32, %v788_v31 }
  0xd0   : > { %816 = vst.msk [vmem:[#allocation2 + $0x11] sm:$0xff] %vm807_vm0, %v805_v33  ;;  %815 = vst.msk [vmem:[#allocation2 + $0x1] sm:$0xff] %vm807_vm0, %v804_v34 }
  0xd1 PF: > { %vm823_vm2 = vcmask 523264   ;;  %v912_v63 = vld [vmem:[%s4203_s16 + $0x78] sm:$0xff]  ;;  %v911_v0 = vld [vmem:[%s4203_s16 + $0x70] sm:$0xff]  ;;  %v910_v1 = vld [vmem:[%s4203_s16 + $0x68] sm:$0xff]  ;;  %v4015_v7 = vmov 0.0   ;;  %s4826_s29 = scalar_lea.vmem %s4780_s4, %s4188_s3  ;;  %s4827_s25 = scalar_lea.vmem %s4781_s5, %s4188_s3  ;;  %vm1039_vm3 = vcmask 130048  }
  0xd2   : > { %953 = vmatprep.subr.mxu0 %v912_v63  ;;  %v909_v2 = vld [vmem:[%s4203_s16 + $0x60] sm:$0xff]  ;;  %v908_v3 = vld [vmem:[%s4203_s16 + $0x58] sm:$0xff]  ;;  %v907_v4 = vld [vmem:[%s4203_s16 + $0x50] sm:$0xff]  ;;  %1001 = vmatprep.mubr.f32.mxu0 %v4015_v7  ;;  %s4016_s12 = smov 64   ;;  %s4018_s23 = smov 112   ;;  %vm2696_vm5 = vcmask 261120  }
  0xd3   : > { %954 = vmatpush1.msra.mxu0 %v911_v0  ;;  %v906_v5 = vld [vmem:[%s4203_s16 + $0x48] sm:$0xff]  ;;  %v905_v6 = vld [vmem:[%s4203_s16 + $0x40] sm:$0xff]  ;;  %v904_v8 = vld [vmem:[%s4203_s16 + $0x38] sm:$0xff]  ;;  %s4019_s19 = smov 32   ;;  %s4020_s20 = smov 96   ;;  %vm2701_vm6 = vcmask 392192  }
  0xd4   : > { %955 = vmatprep.subr.mxu0 %v910_v1  ;;  %v903_v9 = vld [vmem:[%s4203_s16 + $0x30] sm:$0xff]  ;;  %v902_v10 = vld [vmem:[%s4203_s16 + $0x28] sm:$0xff]  ;;  %v901_v11 = vld [vmem:[%s4203_s16 + $0x20] sm:$0xff]  ;;  %s4021_s22 = smov 16   ;;  %s4022_s0 = smov 80  }
  0xd5   : > { %956 = vmatpush1.msra.mxu0 %v909_v2  ;;  %v900_v12 = vld [vmem:[%s4203_s16 + $0x18] sm:$0xff]  ;;  %v899_v13 = vld [vmem:[%s4203_s16 + $0x10] sm:$0xff]  ;;  %v898_v14 = vld [vmem:[%s4203_s16 + $0x8] sm:$0xff]  ;;  %s4828_s26 = scalar_lea.vmem %s4785_s9, %s4188_s3  ;;  %p3425_p9 = scmp.ne.s32.totalorder %s3998_s24, 1 }
  0xd6   : > { %957 = vmatprep.subr.mxu0 %v908_v3  ;;  %v897_v15 = vld [vmem:[%s4203_s16] sm:$0xff] }
  0xd7   : > { %v817_v35 = vld [vmem:[#allocation2] sm:$0xff]  ;;  %v819_v36 = vld [vmem:[#allocation2 + $0x10] sm:$0xff]  ;;  %v818_v37 = vld [vmem:[#allocation2 + $0x8] sm:$0xff]  ;;  %958 = vmatpush1.msra.mxu0 %v907_v4 }
  0xd8   : > { %v824_v38 = vsel %vm823_vm2, %v817_v35, 0.0  ;;  %v830_v39 = vsel %vm823_vm2, %v819_v36, 0.0  ;;  %v820_v40 = vld [vmem:[#allocation2 + $0x18] sm:$0xff]  ;;  %v827_v41 = vsel %vm823_vm2, %v818_v37, 0.0  ;;  %959 = vmatprep.subr.mxu0 %v906_v5  ;;  %v3358_v29 = vld [vmem:[%s4826_s29] ss:$0 sm:$0xff] }
  0xd9   : > { %825 = vadd.xlane.f32.xlu0 %v824_v38  ;;  %831 = vadd.xlane.f32.xlu1 %v830_v39  ;;  %v833_v42 = vsel %vm823_vm2, %v820_v40, 0.0  ;;  %v3359_v31 = vld [vmem:[%s4827_s25] ss:$0 sm:$0xff] }
  0xda   : > { %960 = vmatpush1.msra.mxu0 %v905_v6 }
  0xdb   : > { %961 = vmatprep.subr.mxu0 %v904_v8 }
  0xdc   : > { %962 = vmatpush1.msra.mxu0 %v903_v9 }
  0xdd   : > { %828 = vadd.xlane.f32.xlu0 %v827_v41  ;;  %834 = vadd.xlane.f32.xlu1 %v833_v42 }
  0xde   : > { %963 = vmatprep.subr.mxu0 %v902_v10 }
  0xdf   : > { %964 = vmatpush1.msra.mxu0 %v901_v11 }
  0xe0   : > { %965 = vmatprep.subr.mxu0 %v900_v12 }
  0xe1   : > { %966 = vmatpush1.msra.mxu0 %v899_v13 }
  0xe2   : > { %967 = vmatprep.subr.mxu0 %v898_v14 }
  0xe3   : > { %968 = vmatpush1.msra.mxu0 %v897_v15 }
 0x162   : > { %v826_v43 = vpop.xlane.xlu0 %825  ;;  %v832_v44 = vpop.xlane.xlu1 %831 }
 0x163   : > { %v837_v45 = vmul.f32 0.015625, %v826_v43  ;;  %v839_v46 = vmul.f32 0.015625, %v832_v44 }
 0x165   : > { %v4267_v47 = vsub.f32 %v817_v35, %v837_v45  ;;  %v4269_v48 = vsub.f32 %v819_v36, %v839_v46  ;;  %v915_v46 = vlaneseq }
 0x166   : > { %v829_v49 = vpop.xlane.xlu0 %828  ;;  %v835_v50 = vpop.xlane.xlu1 %834 }
 0x167   : > { %v838_v51 = vmul.f32 0.015625, %v829_v49  ;;  %v840_v52 = vmul.f32 0.015625, %v835_v50  ;;  %v845_v53 = vmul.f32 %v4267_v47, %v4267_v47  ;;  %v847_v54 = vmul.f32 %v4269_v48, %v4269_v48  ;;  %v913_v49 = vld [vmem:[%s4208_s27] sm:$0x3]  ;;  %s4017_s27 = smov 48  }
 0x168   : > { %v4375_v13 = vand.u32 127, %v915_v46 }
 0x169   : > { %v4275_v55 = vsub.f32 %v818_v37, %v838_v51  ;;  %v4277_v56 = vsub.f32 %v820_v40, %v840_v52  ;;  %v849_v57 = vsel %vm823_vm2, %v845_v53, 0.0  ;;  %v855_v58 = vsel %vm823_vm2, %v847_v54, 0.0 }
 0x16a   : > { %850 = vadd.xlane.f32.xlu0 %v849_v57  ;;  %vm1028_vm4 = vcmp.lt.s32.totalorder %v4375_v13, 9 }
 0x16b   : > { %v846_v59 = vmul.f32 %v4275_v55, %v4275_v55  ;;  %v848_v60 = vmul.f32 %v4277_v56, %v4277_v56 }
 0x16d   : > { %v852_v61 = vsel %vm823_vm2, %v846_v59, 0.0  ;;  %v858_v62 = vsel %vm823_vm2, %v848_v60, 0.0 }
 0x16e   : > { %856 = vadd.xlane.f32.xlu0 %v855_v58  ;;  %853 = vadd.xlane.f32.xlu1 %v852_v61 }
 0x172   : > { %859 = vadd.xlane.f32.xlu1 %v858_v62 }
 0x1f3   : > { %v851_v16 = vpop.xlane.xlu0 %850 }
 0x1f4   : > { %v861_v17 = vmul.f32 0.015625, %v851_v16 }
 0x1f6   : > { %v865_v18 = vadd.f32 1e-05, %v861_v17 }
 0x1f7   : > { %v854_v19 = vpop.xlane.xlu1 %853  ;;  %v857_v20 = vpop.xlane.xlu0 %856 }
 0x1f8   : > { %3816 = vrsqrt.f32 %v865_v18  ;;  %v862_v21 = vmul.f32 0.015625, %v854_v19  ;;  %v863_v22 = vmul.f32 0.015625, %v857_v20 }
 0x1fa   : > { %v866_v23 = vadd.f32 1e-05, %v862_v21  ;;  %v867_v24 = vadd.f32 1e-05, %v863_v22 }
 0x1fb   : > { %v860_v25 = vpop.xlane.xlu1 %859 }
 0x1fc   : > { %3818 = vrsqrt.f32 %v866_v23  ;;  %v864_v26 = vmul.f32 0.015625, %v860_v25 }
 0x1fd   : > { %3820 = vrsqrt.f32 %v867_v24 }
 0x1fe   : > { %v868_v27 = vadd.f32 1e-05, %v864_v26 }
 0x200   : > { %3822 = vrsqrt.f32 %v868_v27 }
 0x205   : > { %v3817_v28 = vpop.eup %3816 }
 0x206   : > { %v873_v30 = vmul.f32 %v3817_v28, %v4267_v47  ;;  %v916_v47 = vshrl.u32 %v915_v46, 7 }
 0x208   : > { %v883_v32 = vmul.f32 %v3358_v29, %v873_v30 }
 0x209   : > { %v3819_v33 = vpop.eup %3818 }
 0x20a   : > { %v3821_v34 = vpop.eup %3820  ;;  %v893_v35 = vadd.f32 %v3359_v31, %v883_v32  ;;  %v874_v36 = vmul.f32 %v3819_v33, %v4275_v55 }
 0x20b   : > { %v875_v37 = vmul.f32 %v3821_v34, %v4269_v48  ;;  %v917_v48 = vsub.s32 0, %v916_v47 }
 0x20c   : > { %3360 = vmatmul.mubr.msk.f32.vlgmr.msra.gmra.mxu0 %vm823_vm2, %v893_v35  ;;  %v884_v38 = vmul.f32 %v3358_v29, %v874_v36 }
 0x20d   : > { %v3823_v39 = vpop.eup %3822  ;;  %1007 = vmatprep.mubr.f32.mxu0 %v4015_v7  ;;  %v885_v41 = vmul.f32 %v3358_v29, %v875_v37  ;;  %v918_v50 = vrot.slane %v913_v49, %v917_v48 }
 0x20e   : > { %v894_v40 = vadd.f32 %v3359_v31, %v884_v38  ;;  %v876_v42 = vmul.f32 %v3823_v39, %v4277_v56  ;;  %v921_v56 = vsub.s32 1, %v916_v47 }
 0x20f   : > { %v895_v43 = vadd.f32 %v3359_v31, %v885_v41 }
 0x210   : > { %3361 = vmatmul.mubr.msk.f32.gmra.mxu0 %vm823_vm2, %v894_v40  ;;  %v886_v44 = vmul.f32 %v3358_v29, %v876_v42  ;;  %v922_v60 = vrot.slane %v913_v49, %v921_v56 }
 0x211   : > { %1013 = vmatprep.mubr.f32.mxu0 %v4015_v7 }
 0x212   : > { %v896_v45 = vadd.f32 %v3359_v31, %v886_v44 }
 0x214   : > { %3362 = vmatmul.mubr.msk.f32.gmra.mxu0 %vm823_vm2, %v895_v43 }
 0x215   : > { %1019 = vmatprep.mubr.f32.mxu0 %v4015_v7 }
 0x218   : > { %3363 = vmatmul.mubr.msk.f32.gmra.mxu0 %vm823_vm2, %v896_v45 }
 0x2cc   : > { %v1003_v51 = vpop.f32.mrf.mxu0 }
 0x2cd   : > { %v4322_v52 = vadd.f32 %v1003_v51, %v918_v50 }
 0x2ce   : > { %v1005_v53 = vpop.f32.mrf.mxu0 }
 0x2cf   : > { %1035 = vrot.lane.b32.xlu1 %v4322_v52, %s4016_s12  ;;  %v4326_v54 = vmul.f32 0.25, %v4322_v52  ;;  %v4365_v11 = vadd.f32 %v1005_v53, %v922_v60 }
 0x2d0   : > { %v1009_v55 = vpop.f32.mrf.mxu0 }
 0x2d1   : > { %v4328_v57 = vadd.f32 %v1009_v55, %v918_v50  ;;  %3546 = vmatprep.mubr.msk.f32.mxu1 %vm1039_vm3, %v4326_v54 }
 0x2d2   : > { %v1011_v58 = vpop.f32.mrf.mxu0 }
 0x2d3   : > { %1037 = vrot.lane.b32.xlu0 %v4328_v57, %s4016_s12  ;;  %v4346_v4 = vmul.f32 0.25, %v4328_v57  ;;  %v4357_v8 = vadd.f32 %v1011_v58, %v922_v60 }
 0x2d4   : > { %v1015_v59 = vpop.f32.mrf.mxu0 }
 0x2d5   : > { %v4338_v1 = vadd.f32 %v1015_v59, %v918_v50 }
 0x2d6   : > { %v1017_v61 = vpop.f32.mrf.mxu0 }
 0x2d7   : > { %v4333_v62 = vadd.f32 %v1017_v61, %v922_v60  ;;  %v4349_v6 = vmul.f32 0.25, %v4338_v1 }
 0x2d8   : > { %v1021_v63 = vpop.f32.mrf.mxu0 }
 0x2d9   : > { %v4335_v0 = vadd.f32 %v1021_v63, %v918_v50 }
 0x2da   : > { %v1023_v10 = vpop.f32.mrf.mxu0 }
 0x2db   : > { %1129 = vrot.lane.b32.xlu1 %v4335_v0, %s4016_s12  ;;  %v4363_v9 = vmul.f32 0.25, %v4335_v0  ;;  %v4370_v12 = vadd.f32 %v1023_v10, %v922_v60 }
 0x2df   : > { %1127 = vrot.lane.b32.xlu1 %v4338_v1, %s4016_s12 }
 0x341   : > { %v1036_v3 = vpop.permute.xlu1 %1035 }
 0x345   : > { %v1038_v2 = vpop.permute.xlu0 %1037 }
 0x346   : > { %3542 = vmatprep.subr.msk.mxu1 %vm1039_vm3, %v1038_v2 }
 0x347   : > { %3543 = vmatpush3.xpose.msk.msra.mxu1 %vm1039_vm3, %v1038_v2 }
 0x348   : > { %3544 = vmatprep.subr.msk.mxu1 %vm1039_vm3, %v1036_v3 }
 0x34b   : > { %3545 = vmatpush3.xpose.msk.msra.mxu1 %vm1039_vm3, %v1036_v3 }
 0x34d   : > { %v1130_v5 = vpop.permute.xlu1 %1129 }
 0x34e   : > { %3547 = vmatmul.mubr.msk.f32.vlgmr.msra.gmra.mxu1 %vm1039_vm3, %v4346_v4  ;;  %3549 = vmatprep.subr.msk.mxu1 %vm1039_vm3, %v1130_v5 }
 0x34f   : > { %3550 = vmatpush3.xpose.msk.msra.mxu1 %vm1039_vm3, %v1130_v5  ;;  %3553 = vmatprep.mubr.msk.f32.mxu1 %vm1039_vm3, %v4349_v6 }
 0x351   : > { %v1128_v7 = vpop.permute.xlu1 %1127 }
 0x352   : > { %3551 = vmatprep.subr.msk.mxu1 %vm1039_vm3, %v1128_v7 }
 0x353   : > { %3552 = vmatpush3.xpose.msk.msra.mxu1 %vm1039_vm3, %v1128_v7 }
 0x354   : > { %3556 = vmatprep.subr.mxu1 %v4357_v8 }
 0x356   : > { %3554 = vmatmul.mubr.msk.f32.vlgmr.msra.gmra.mxu1 %vm1039_vm3, %v4363_v9 }
 0x357   : > { %3557 = vmatpush3.msra.mxu1 %v4357_v8 }
 0x358   : > { %3558 = vmatprep.subr.mxu1 %v4365_v11 }
 0x359   : > { %3559 = vmatpush3.msra.mxu1 %v4365_v11 }
 0x35a   : > { %3563 = vmatprep.subr.mxu1 %v4370_v12 }
 0x40e   : > { %v3548_v14 = vpop.f32.mrf.mxu1 }
 0x40f   : > { %v1219_v15 = vsel %vm1028_vm4, %v3548_v14, -1e+30 }
 0x410   : > { %v1116_v16 = vpop.f32.mrf.mxu1  ;;  %v1225_v17 = vsel %vm1039_vm3, %v1219_v15, -inf }
 0x411   : > { %v1218_v18 = vsel %vm1028_vm4, %v1116_v16, -1e+30  ;;  %1226 = vmax.xlane.f32.xlu1 %v1225_v17 }
 0x412   : > { %v1222_v19 = vsel %vm1039_vm3, %v1218_v18, -inf }
 0x413   : > { %1223 = vmax.xlane.f32.xlu0 %v1222_v19 }
 0x416   : > { %v3555_v20 = vpop.f32.mrf.mxu1 }
 0x417   : > { %v1221_v24 = vsel %vm1028_vm4, %v3555_v20, -1e+30 }
 0x418   : > { %v1207_v21 = vpop.f32.mrf.mxu1  ;;  %v1231_v25 = vsel %vm1039_vm3, %v1221_v24, -inf }
 0x419   : > { %v1220_v22 = vsel %vm1028_vm4, %v1207_v21, -1e+30 }
 0x41a   : > { %v1228_v23 = vsel %vm1039_vm3, %v1220_v22, -inf }
 0x41b   : > { %1229 = vmax.xlane.f32.xlu0 %v1228_v23 }
 0x41f   : > { %1232 = vmax.xlane.f32.xlu0 %v1231_v25 }
 0x422   : > { %1432 = vrot.lane.b32.xlu1 %v4322_v52, %s4017_s27 }
 0x426   : > { %1525 = vrot.lane.b32.xlu1 %v4335_v0, %s4017_s27 }
 0x42a   : > { %1428 = vrot.lane.b32.xlu1 %v4326_v54, %s4018_s23 }
 0x435   : > { %1434 = vrot.lane.b32.xlu0 %v4328_v57, %s4017_s27 }
 0x49a   : > { %v1227_v26 = vpop.xlane.xlu1 %1226 }
 0x49b   : > { %v1235_v27 = vsub.f32 %v1219_v15, %v1227_v26 }
 0x49c   : > { %v1224_v28 = vpop.xlane.xlu0 %1223 }
 0x49d   : > { %v1240_v29 = vmul.f32 1.442695, %v1235_v27  ;;  %v1234_v30 = vsub.f32 %v1218_v18, %v1224_v28 }
 0x49e   : > { %v1433_v31 = vpop.permute.xlu1 %1432 }
 0x49f   : > { %3824 = vpow2.f32 %v1240_v29  ;;  %v1238_v32 = vmul.f32 1.442695, %v1234_v30 }
 0x4a1   : > { %3826 = vpow2.f32 %v1238_v32 }
 0x4a2   : > { %v1526_v33 = vpop.permute.xlu1 %1525 }
 0x4a4   : > { %v1230_v34 = vpop.xlane.xlu0 %1229 }
 0x4a5   : > { %v1236_v35 = vsub.f32 %v1220_v22, %v1230_v34 }
 0x4a6   : > { %v1429_v36 = vpop.permute.xlu1 %1428 }
 0x4a7   : > { %v1242_v37 = vmul.f32 1.442695, %v1236_v35  ;;  %3574 = vmatprep.mubr.msk.f32.mxu0 %vm1039_vm3, %v1429_v36 }
 0x4a8   : > { %v1233_v38 = vpop.xlane.xlu0 %1232 }
 0x4a9   : > { %3828 = vpow2.f32 %v1242_v37  ;;  %v1237_v39 = vsub.f32 %v1221_v24, %v1233_v38 }
 0x4ab   : > { %v1244_v40 = vmul.f32 1.442695, %v1237_v39 }
 0x4ac   : > { %v3825_v41 = vpop.eup %3824  ;;  %v1435_v42 = vpop.permute.xlu0 %1434 }
 0x4ad   : > { %3830 = vpow2.f32 %v1244_v40  ;;  %3570 = vmatprep.subr.msk.mxu0 %vm1039_vm3, %v1435_v42  ;;  %v1249_v43 = vsel %vm1039_vm3, %v3825_v41, 0.0 }
 0x4ae   : > { %v3827_v44 = vpop.eup %3826  ;;  %1250 = vadd.xlane.f32.xlu1 %v1249_v43  ;;  %3571 = vmatpush3.xpose.msk.msra.mxu0 %vm1039_vm3, %v1435_v42 }
 0x4af   : > { %3572 = vmatprep.subr.msk.mxu0 %vm1039_vm3, %v1433_v31  ;;  %v1246_v45 = vsel %vm1039_vm3, %v3827_v44, 0.0 }
 0x4b0   : > { %1247 = vadd.xlane.f32.xlu0 %v1246_v45 }
 0x4b2   : > { %3573 = vmatpush3.xpose.msk.msra.mxu0 %vm1039_vm3, %v1433_v31 }
 0x4b6   : > { %v3829_v46 = vpop.eup %3828 }
 0x4b7   : > { %v1252_v47 = vsel %vm1039_vm3, %v3829_v46, 0.0 }
 0x4b8   : > { %1253 = vadd.xlane.f32.xlu0 %v1252_v47 }
 0x4ba   : > { %v3831_v48 = vpop.eup %3830 }
 0x4bb   : > { %v1255_v49 = vsel %vm1039_vm3, %v3831_v48, 0.0 }
 0x4bc   : > { %1256 = vadd.xlane.f32.xlu1 %v1255_v49 }
 0x4cd   : > { %1523 = vrot.lane.b32.xlu1 %v4338_v1, %s4017_s27 }
 0x4ce   : > { %1430 = vrot.lane.b32.xlu0 %v4346_v4, %s4018_s23 }
 0x4d1   : > { %1521 = vrot.lane.b32.xlu1 %v4363_v9, %s4018_s23 }
 0x4d2   : > { %1519 = vrot.lane.b32.xlu0 %v4349_v6, %s4018_s23 }
 0x537   : > { %v1251_v50 = vpop.xlane.xlu1 %1250 }
 0x538   : > { %3832 = vrcp.f32 %v1251_v50 }
 0x539   : > { %v1248_v51 = vpop.xlane.xlu0 %1247 }
 0x53a   : > { %3834 = vrcp.f32 %v1248_v51 }
 0x541   : > { %v1254_v53 = vpop.xlane.xlu0 %1253 }
 0x542   : > { %3836 = vrcp.f32 %v1254_v53 }
 0x545   : > { %v1257_v55 = vpop.xlane.xlu1 %1256  ;;  %v1431_v56 = vpop.permute.xlu0 %1430 }
 0x546   : > { %v3833_v58 = vpop.eup %3832  ;;  %3838 = vrcp.f32 %v1257_v55  ;;  %3575 = vmatmul.mubr.msk.f32.vlgmr.msra.gmra.mxu0 %vm1039_vm3, %v1431_v56 }
 0x547   : > { %v3835_v59 = vpop.eup %3834  ;;  %v1263_v61 = vmul.f32 %v3833_v58, %v3825_v41 }
 0x548   : > { %v1262_v60 = vmul.f32 %v3835_v59, %v3827_v44 }
 0x549   : > { %v1520_v7 = vpop.permute.xlu0 %1519  ;;  %v1524_v10 = vpop.permute.xlu1 %1523 }
 0x54a   : > { %3560 = vmatprep.mubr.msk.f32.mxu1 %vm1039_vm3, %v1262_v60 }
 0x54b   : > { %3561 = vmatmul.mubr.msk.f32.vlgmr.msra.gmra.mxu1 %vm1039_vm3, %v1263_v61 }
 0x54c   : > { %3564 = vmatpush3.msra.mxu1 %v4370_v12 }
 0x54d   : > { %3565 = vmatprep.subr.mxu1 %v4333_v62  ;;  %v1522_v14 = vpop.permute.xlu1 %1521 }
 0x54e   : > { %3566 = vmatpush3.msra.mxu1 %v4333_v62 }
 0x54f   : > { %v3837_v63 = vpop.eup %3836  ;;  %3577 = vmatprep.subr.msk.mxu1 %vm1039_vm3, %v1526_v33 }
 0x550   : > { %v1264_v2 = vmul.f32 %v3837_v63, %v3829_v46 }
 0x552   : > { %3567 = vmatprep.mubr.msk.f32.mxu1 %vm1039_vm3, %v1264_v2 }
 0x553   : > { %v3839_v3 = vpop.eup %3838 }
 0x554   : > { %v1265_v5 = vmul.f32 %v3839_v3, %v3831_v48 }
 0x556   : > { %3568 = vmatmul.mubr.msk.f32.vlgmr.msra.gmra.mxu1 %vm1039_vm3, %v1265_v5 }
 0x557   : > { %3578 = vmatpush3.xpose.msk.msra.mxu1 %vm1039_vm3, %v1526_v33  ;;  %3581 = vmatprep.mubr.msk.f32.mxu1 %vm1039_vm3, %v1520_v7 }
 0x558   : > { %3579 = vmatprep.subr.msk.mxu1 %vm1039_vm3, %v1524_v10 }
 0x55b   : > { %3580 = vmatpush3.xpose.msk.msra.mxu1 %vm1039_vm3, %v1524_v10 }
 0x55e   : > { %3582 = vmatmul.mubr.msk.f32.vlgmr.msra.gmra.mxu1 %vm1039_vm3, %v1522_v14 }
 0x606   : > { %v3576_v15 = vpop.f32.mrf.mxu0 }
 0x607   : > { %v1611_v16 = vsel %vm1028_vm4, %v3576_v15, -1e+30 }
 0x608   : > { %v1510_v17 = vpop.f32.mrf.mxu0  ;;  %v1617_v18 = vsel %vm1039_vm3, %v1611_v16, -inf }
 0x609   : > { %v1610_v19 = vsel %vm1028_vm4, %v1510_v17, -1e+30  ;;  %1618 = vmax.xlane.f32.xlu1 %v1617_v18 }
 0x60a   : > { %v1614_v20 = vsel %vm1039_vm3, %v1610_v19, -inf }
 0x60b   : > { %1615 = vmax.xlane.f32.xlu0 %v1614_v20  ;;  %v4435_v21 = vpop.f32.mrf.mxu1 }
 0x60d   : > { %v4437_v22 = vpop.f32.mrf.mxu1 }
 0x616   : > { %v4439_v23 = vpop.f32.mrf.mxu1 }
 0x618   : > { %v4441_v24 = vpop.f32.mrf.mxu1 }
 0x61e   : > { %v3583_v25 = vpop.f32.mrf.mxu1 }
 0x61f   : > { %v1613_v29 = vsel %vm1028_vm4, %v3583_v25, -1e+30 }
 0x620   : > { %v1601_v26 = vpop.f32.mrf.mxu1  ;;  %v1623_v30 = vsel %vm1039_vm3, %v1613_v29, -inf }
 0x621   : > { %v1612_v27 = vsel %vm1028_vm4, %v1601_v26, -1e+30 }
 0x622   : > { %v1620_v28 = vsel %vm1039_vm3, %v1612_v27, -inf }
 0x623   : > { %1621 = vmax.xlane.f32.xlu0 %v1620_v28 }
 0x627   : > { %1624 = vmax.xlane.f32.xlu0 %v1623_v30 }
 0x692   : > { %v1619_v31 = vpop.xlane.xlu1 %1618 }
 0x693   : > { %v1627_v32 = vsub.f32 %v1611_v16, %v1619_v31 }
 0x694   : > { %v1616_v33 = vpop.xlane.xlu0 %1615 }
 0x695   : > { %v1632_v34 = vmul.f32 1.442695, %v1627_v32  ;;  %v1626_v35 = vsub.f32 %v1610_v19, %v1616_v33 }
 0x697   : > { %3840 = vpow2.f32 %v1632_v34  ;;  %v1630_v36 = vmul.f32 1.442695, %v1626_v35 }
 0x699   : > { %3842 = vpow2.f32 %v1630_v36 }
 0x6a4   : > { %v3841_v37 = vpop.eup %3840 }
 0x6a5   : > { %v1641_v38 = vsel %vm1039_vm3, %v3841_v37, 0.0 }
 0x6a6   : > { %v3843_v39 = vpop.eup %3842  ;;  %1642 = vadd.xlane.f32.xlu1 %v1641_v38 }
 0x6a7   : > { %v1638_v40 = vsel %vm1039_vm3, %v3843_v39, 0.0 }
 0x6a8   : > { %1639 = vadd.xlane.f32.xlu0 %v1638_v40 }
 0x6ac   : > { %v1622_v41 = vpop.xlane.xlu0 %1621 }
 0x6ad   : > { %v1628_v42 = vsub.f32 %v1612_v27, %v1622_v41 }
 0x6af   : > { %v1634_v44 = vmul.f32 1.442695, %v1628_v42 }
 0x6b0   : > { %v1625_v43 = vpop.xlane.xlu0 %1624 }
 0x6b1   : > { %v1629_v45 = vsub.f32 %v1613_v29, %v1625_v43  ;;  %3844 = vpow2.f32 %v1634_v44 }
 0x6b3   : > { %v1636_v46 = vmul.f32 1.442695, %v1629_v45 }
 0x6b5   : > { %3846 = vpow2.f32 %v1636_v46 }
 0x6b7   : > { %1660 = vrot.lane.b32.xlu1 %v4365_v11, %s4018_s23 }
 0x6bb   : > { %1751 = vrot.lane.b32.xlu1 %v4370_v12, %s4018_s23 }
 0x6be   : > { %1662 = vrot.lane.b32.xlu0 %v4357_v8, %s4018_s23  ;;  %v3845_v47 = vpop.eup %3844 }
 0x6bf   : > { %1842 = vrot.lane.b32.xlu1 %v4328_v57, %s4019_s19  ;;  %v1644_v48 = vsel %vm1039_vm3, %v3845_v47, 0.0 }
 0x6c2   : > { %1749 = vrot.lane.b32.xlu0 %v4333_v62, %s4018_s23  ;;  %v3847_v49 = vpop.eup %3846 }
 0x6c3   : > { %1840 = vrot.lane.b32.xlu1 %v4322_v52, %s4019_s19  ;;  %v1647_v50 = vsel %vm1039_vm3, %v3847_v49, 0.0 }
 0x6c6   : > { %1933 = vrot.lane.b32.xlu0 %v4335_v0, %s4019_s19 }
 0x6c7   : > { %1836 = vrot.lane.b32.xlu1 %v4326_v54, %s4020_s20 }
 0x6e5   : > { %1645 = vadd.xlane.f32.xlu0 %v1644_v48 }
 0x6eb   : > { %1648 = vadd.xlane.f32.xlu1 %v1647_v50 }
 0x6fb   : > { %1838 = vrot.lane.b32.xlu0 %v4346_v4, %s4020_s20 }
 0x6fc   : > { %1931 = vrot.lane.b32.xlu1 %v4338_v1, %s4019_s19 }
 0x6ff   : > { %1927 = vrot.lane.b32.xlu0 %v4349_v6, %s4020_s20 }
 0x700   : > { %1929 = vrot.lane.b32.xlu1 %v4363_v9, %s4020_s20 }
 0x72f   : > { %v1643_v51 = vpop.xlane.xlu1 %1642 }
 0x730   : > { %3848 = vrcp.f32 %v1643_v51 }
 0x731   : > { %v1640_v53 = vpop.xlane.xlu0 %1639 }
 0x732   : > { %3850 = vrcp.f32 %v1640_v53 }
 0x733   : > { %v1661_v55 = vpop.permute.xlu1 %1660 }
 0x735   : > { %v1663_v56 = vpop.permute.xlu0 %1662 }
 0x736   : > { %3584 = vmatprep.subr.mxu0 %v1663_v56 }
 0x737   : > { %v1752_v58 = vpop.permute.xlu1 %1751  ;;  %3585 = vmatpush3.msra.mxu0 %v1663_v56 }
 0x738   : > { %3586 = vmatprep.subr.mxu0 %v1661_v55  ;;  %3591 = vmatprep.subr.mxu1 %v1752_v58 }
 0x739   : > { %3587 = vmatpush3.msra.mxu0 %v1661_v55  ;;  %3592 = vmatpush3.msra.mxu1 %v1752_v58  ;;  %v1750_v59 = vpop.permute.xlu0 %1749 }
 0x73a   : > { %3593 = vmatprep.subr.mxu1 %v1750_v59 }
 0x73b   : > { %v1843_v60 = vpop.permute.xlu1 %1842  ;;  %3594 = vmatpush3.msra.mxu1 %v1750_v59 }
 0x73c   : > { %3598 = vmatprep.subr.msk.mxu0 %vm1039_vm3, %v1843_v60 }
 0x73d   : > { %v1934_v61 = vpop.permute.xlu0 %1933  ;;  %v3849_v63 = vpop.eup %3848 }
 0x73e   : > { %3605 = vmatprep.subr.msk.mxu1 %vm1039_vm3, %v1934_v61  ;;  %v1655_v7 = vmul.f32 %v3849_v63, %v3841_v37 }
 0x73f   : > { %v3851_v2 = vpop.eup %3850  ;;  %v1841_v3 = vpop.permute.xlu1 %1840 }
 0x740   : > { %v1654_v5 = vmul.f32 %v3851_v2, %v3843_v39 }
 0x742   : > { %3588 = vmatprep.mubr.msk.f32.mxu0 %vm1039_vm3, %v1654_v5 }
 0x743   : > { %v1837_v10 = vpop.permute.xlu1 %1836  ;;  %3589 = vmatmul.mubr.msk.f32.vlgmr.msra.gmra.mxu0 %vm1039_vm3, %v1655_v7 }
 0x744   : > { %3599 = vmatpush3.xpose.msk.msra.mxu0 %vm1039_vm3, %v1843_v60  ;;  %3602 = vmatprep.mubr.msk.f32.mxu0 %vm1039_vm3, %v1837_v10 }
 0x745   : > { %3600 = vmatprep.subr.msk.mxu0 %vm1039_vm3, %v1841_v3 }
 0x748   : > { %3601 = vmatpush3.xpose.msk.msra.mxu0 %vm1039_vm3, %v1841_v3 }
 0x76e   : > { %v1646_v14 = vpop.xlane.xlu0 %1645 }
 0x76f   : > { %3852 = vrcp.f32 %v1646_v14 }
 0x772   : > { %v1839_v15 = vpop.permute.xlu0 %1838 }
 0x773   : > { %3603 = vmatmul.mubr.msk.f32.vlgmr.msra.gmra.mxu0 %vm1039_vm3, %v1839_v15 }
 0x774   : > { %v1649_v16 = vpop.xlane.xlu1 %1648 }
 0x775   : > { %3854 = vrcp.f32 %v1649_v16 }
 0x776   : > { %v1928_v25 = vpop.permute.xlu0 %1927 }
 0x778   : > { %v1932_v26 = vpop.permute.xlu1 %1931 }
 0x77c   : > { %v3853_v17 = vpop.eup %3852  ;;  %v1930_v27 = vpop.permute.xlu1 %1929 }
 0x77d   : > { %v1656_v18 = vmul.f32 %v3853_v17, %v3845_v47 }
 0x77f   : > { %3595 = vmatprep.mubr.msk.f32.mxu1 %vm1039_vm3, %v1656_v18 }
 0x782   : > { %v3855_v19 = vpop.eup %3854 }
 0x783   : > { %v1657_v20 = vmul.f32 %v3855_v19, %v3847_v49 }
 0x785   : > { %3596 = vmatmul.mubr.msk.f32.vlgmr.msra.gmra.mxu1 %vm1039_vm3, %v1657_v20 }
 0x786   : > { %3606 = vmatpush3.xpose.msk.msra.mxu1 %vm1039_vm3, %v1934_v61  ;;  %3609 = vmatprep.mubr.msk.f32.mxu1 %vm1039_vm3, %v1928_v25 }
 0x787   : > { %3607 = vmatprep.subr.msk.mxu1 %vm1039_vm3, %v1932_v26 }
 0x78a   : > { %3608 = vmatpush3.xpose.msk.msra.mxu1 %vm1039_vm3, %v1932_v26 }
 0x78d   : > { %3610 = vmatmul.mubr.msk.f32.vlgmr.msra.gmra.mxu1 %vm1039_vm3, %v1930_v27 }
 0x803   : > { %v4493_v28 = vpop.f32.mrf.mxu0 }
 0x805   : > { %v4495_v29 = vpop.f32.mrf.mxu0 }
 0x833   : > { %v3604_v30 = vpop.f32.mrf.mxu0 }
 0x834   : > { %v2019_v31 = vsel %vm1028_vm4, %v3604_v30, -1e+30 }
 0x835   : > { %v1918_v32 = vpop.f32.mrf.mxu0  ;;  %v2025_v33 = vsel %vm1039_vm3, %v2019_v31, -inf }
 0x836   : > { %v2018_v34 = vsel %vm1028_vm4, %v1918_v32, -1e+30  ;;  %2026 = vmax.xlane.f32.xlu1 %v2025_v33 }
 0x837   : > { %v2022_v35 = vsel %vm1039_vm3, %v2018_v34, -inf }
 0x838   : > { %2023 = vmax.xlane.f32.xlu0 %v2022_v35 }
 0x845   : > { %v4503_v36 = vpop.f32.mrf.mxu1 }
 0x847   : > { %v4505_v37 = vpop.f32.mrf.mxu1 }
 0x84d   : > { %v3611_v38 = vpop.f32.mrf.mxu1 }
 0x84e   : > { %v2021_v42 = vsel %vm1028_vm4, %v3611_v38, -1e+30 }
 0x84f   : > { %v2009_v39 = vpop.f32.mrf.mxu1  ;;  %v2031_v43 = vsel %vm1039_vm3, %v2021_v42, -inf }
 0x850   : > { %v2020_v40 = vsel %vm1028_vm4, %v2009_v39, -1e+30 }
 0x851   : > { %v2028_v41 = vsel %vm1039_vm3, %v2020_v40, -inf }
 0x852   : > { %2029 = vmax.xlane.f32.xlu0 %v2028_v41 }
 0x856   : > { %2032 = vmax.xlane.f32.xlu0 %v2031_v43 }
 0x8bf   : > { %v2027_v44 = vpop.xlane.xlu1 %2026 }
 0x8c0   : > { %v2035_v45 = vsub.f32 %v2019_v31, %v2027_v44 }
 0x8c1   : > { %v2024_v46 = vpop.xlane.xlu0 %2023 }
 0x8c2   : > { %v2040_v47 = vmul.f32 1.442695, %v2035_v45  ;;  %v2034_v48 = vsub.f32 %v2018_v34, %v2024_v46 }
 0x8c4   : > { %3856 = vpow2.f32 %v2040_v47  ;;  %v2038_v49 = vmul.f32 1.442695, %v2034_v48 }
 0x8c6   : > { %3858 = vpow2.f32 %v2038_v49 }
 0x8d1   : > { %v3857_v50 = vpop.eup %3856 }
 0x8d2   : > { %v2049_v51 = vsel %vm1039_vm3, %v3857_v50, 0.0 }
 0x8d3   : > { %v3859_v53 = vpop.eup %3858  ;;  %2050 = vadd.xlane.f32.xlu1 %v2049_v51 }
 0x8d4   : > { %v2046_v55 = vsel %vm1039_vm3, %v3859_v53, 0.0 }
 0x8d5   : > { %2047 = vadd.xlane.f32.xlu0 %v2046_v55 }
 0x8db   : > { %v2030_v56 = vpop.xlane.xlu0 %2029 }
 0x8dc   : > { %v2036_v58 = vsub.f32 %v2020_v40, %v2030_v56 }
 0x8de   : > { %v2042_v60 = vmul.f32 1.442695, %v2036_v58 }
 0x8df   : > { %v2033_v59 = vpop.xlane.xlu0 %2032 }
 0x8e0   : > { %v2037_v61 = vsub.f32 %v2021_v42, %v2033_v59  ;;  %3860 = vpow2.f32 %v2042_v60 }
 0x8e4   : > { %2066 = vrot.lane.b32.xlu1 %v4365_v11, %s4020_s20 }
 0x8e8   : > { %2155 = vrot.lane.b32.xlu1 %v4370_v12, %s4020_s20 }
 0x8eb   : > { %2068 = vrot.lane.b32.xlu0 %v4357_v8, %s4020_s20 }
 0x8ec   : > { %2246 = vrot.lane.b32.xlu1 %v4328_v57, %s4021_s22  ;;  %v2044_v57 = vmul.f32 1.442695, %v2037_v61 }
 0x8ed   : > { %v3861_v63 = vpop.eup %3860 }
 0x8ee   : > { %3862 = vpow2.f32 %v2044_v57  ;;  %v2052_v2 = vsel %vm1039_vm3, %v3861_v63, 0.0 }
 0x8ef   : > { %2153 = vrot.lane.b32.xlu0 %v4333_v62, %s4020_s20 }
 0x8f0   : > { %2244 = vrot.lane.b32.xlu1 %v4322_v52, %s4021_s22 }
 0x8f3   : > { %2337 = vrot.lane.b32.xlu0 %v4335_v0, %s4021_s22 }
 0x8f4   : > { %2240 = vrot.lane.b32.xlu1 %v4326_v54, %s4022_s0 }
 0x8fb   : > { %v3863_v52 = vpop.eup %3862 }
 0x8fc   : > { %v2055_v3 = vsel %vm1039_vm3, %v3863_v52, 0.0 }
 0x912   : > { %2053 = vadd.xlane.f32.xlu0 %v2052_v2 }
 0x918   : > { %2056 = vadd.xlane.f32.xlu1 %v2055_v3 }
 0x928   : > { %2242 = vrot.lane.b32.xlu0 %v4346_v4, %s4022_s0 }
 0x929   : > { %2335 = vrot.lane.b32.xlu1 %v4338_v1, %s4021_s22 }
 0x92c   : > { %2331 = vrot.lane.b32.xlu0 %v4349_v6, %s4022_s0 }
 0x92d   : > { %2333 = vrot.lane.b32.xlu1 %v4363_v9, %s4022_s0 }
 0x95c   : > { %v2051_v54 = vpop.xlane.xlu1 %2050 }
 0x95d   : > { %3864 = vrcp.f32 %v2051_v54 }
 0x95e   : > { %v2048_v0 = vpop.xlane.xlu0 %2047 }
 0x95f   : > { %3866 = vrcp.f32 %v2048_v0 }
 0x960   : > { %v2067_v5 = vpop.permute.xlu1 %2066 }
 0x962   : > { %v2069_v7 = vpop.permute.xlu0 %2068 }
 0x963   : > { %3612 = vmatprep.subr.mxu0 %v2069_v7 }
 0x964   : > { %v2156_v10 = vpop.permute.xlu1 %2155  ;;  %3613 = vmatpush3.msra.mxu0 %v2069_v7 }
 0x965   : > { %3614 = vmatprep.subr.mxu0 %v2067_v5  ;;  %3619 = vmatprep.subr.mxu1 %v2156_v10 }
 0x966   : > { %3615 = vmatpush3.msra.mxu0 %v2067_v5  ;;  %3620 = vmatpush3.msra.mxu1 %v2156_v10  ;;  %v2154_v1 = vpop.permute.xlu0 %2153 }
 0x967   : > { %3621 = vmatprep.subr.mxu1 %v2154_v1 }
 0x968   : > { %v2247_v4 = vpop.permute.xlu1 %2246  ;;  %3622 = vmatpush3.msra.mxu1 %v2154_v1 }
 0x969   : > { %3626 = vmatprep.subr.msk.mxu0 %vm1039_vm3, %v2247_v4 }
 0x96a   : > { %v2338_v6 = vpop.permute.xlu0 %2337  ;;  %v3865_v9 = vpop.eup %3864 }
 0x96b   : > { %3633 = vmatprep.subr.msk.mxu1 %vm1039_vm3, %v2338_v6  ;;  %v2063_v17 = vmul.f32 %v3865_v9, %v3857_v50 }
 0x96c   : > { %v3867_v14 = vpop.eup %3866  ;;  %v2245_v15 = vpop.permute.xlu1 %2244 }
 0x96d   : > { %v2062_v16 = vmul.f32 %v3867_v14, %v3859_v53 }
 0x96f   : > { %3616 = vmatprep.mubr.msk.f32.mxu0 %vm1039_vm3, %v2062_v16 }
 0x970   : > { %v2241_v18 = vpop.permute.xlu1 %2240  ;;  %3617 = vmatmul.mubr.msk.f32.vlgmr.msra.gmra.mxu0 %vm1039_vm3, %v2063_v17 }
 0x971   : > { %3627 = vmatpush3.xpose.msk.msra.mxu0 %vm1039_vm3, %v2247_v4  ;;  %3630 = vmatprep.mubr.msk.f32.mxu0 %vm1039_vm3, %v2241_v18 }
 0x972   : > { %3628 = vmatprep.subr.msk.mxu0 %vm1039_vm3, %v2245_v15 }
 0x975   : > { %3629 = vmatpush3.xpose.msk.msra.mxu0 %vm1039_vm3, %v2245_v15 }
 0x99b   : > { %v2054_v19 = vpop.xlane.xlu0 %2053 }
 0x99c   : > { %3868 = vrcp.f32 %v2054_v19 }
 0x99f   : > { %v2243_v20 = vpop.permute.xlu0 %2242 }
 0x9a0   : > { %3631 = vmatmul.mubr.msk.f32.vlgmr.msra.gmra.mxu0 %vm1039_vm3, %v2243_v20 }
 0x9a1   : > { %v2057_v25 = vpop.xlane.xlu1 %2056 }
 0x9a2   : > { %3870 = vrcp.f32 %v2057_v25 }
 0x9a3   : > { %v2332_v32 = vpop.permute.xlu0 %2331 }
 0x9a5   : > { %v2336_v33 = vpop.permute.xlu1 %2335 }
 0x9a9   : > { %v3869_v26 = vpop.eup %3868  ;;  %v2334_v34 = vpop.permute.xlu1 %2333 }
 0x9aa   : > { %v2064_v27 = vmul.f32 %v3869_v26, %v3861_v63 }
 0x9ac   : > { %3623 = vmatprep.mubr.msk.f32.mxu1 %vm1039_vm3, %v2064_v27  ;;  %v2713_v27 = vld [vmem:[%s4218_s21 + $0x38] sm:$0xff] }
 0x9af   : > { %v3871_v30 = vpop.eup %3870 }
 0x9b0   : > { %v2065_v31 = vmul.f32 %v3871_v30, %v3863_v52  ;;  %v2712_v30 = vld [vmem:[%s4218_s21 + $0x30] sm:$0xff] }
 0x9b2   : > { %3624 = vmatmul.mubr.msk.f32.vlgmr.msra.gmra.mxu1 %vm1039_vm3, %v2065_v31  ;;  %v2711_v31 = vld [vmem:[%s4218_s21 + $0x28] sm:$0xff] }
 0x9b3   : > { %3634 = vmatpush3.xpose.msk.msra.mxu1 %vm1039_vm3, %v2338_v6  ;;  %3637 = vmatprep.mubr.msk.f32.mxu1 %vm1039_vm3, %v2332_v32  ;;  %v2710_v32 = vld [vmem:[%s4218_s21 + $0x20] sm:$0xff] }
 0x9b4   : > { %3635 = vmatprep.subr.msk.mxu1 %vm1039_vm3, %v2336_v33 }
 0x9b7   : > { %3636 = vmatpush3.xpose.msk.msra.mxu1 %vm1039_vm3, %v2336_v33  ;;  %v2709_v33 = vld [vmem:[%s4218_s21 + $0x18] sm:$0xff] }
 0x9ba   : > { %3638 = vmatmul.mubr.msk.f32.vlgmr.msra.gmra.mxu1 %vm1039_vm3, %v2334_v34  ;;  %v2708_v34 = vld [vmem:[%s4218_s21 + $0x10] sm:$0xff] }
 0xa30   : > { %v3618_v35 = vpop.f32.mrf.mxu0 }
 0xa32   : > { %v2144_v38 = vpop.f32.mrf.mxu0 }
 0xa60   : > { %v3632_v39 = vpop.f32.mrf.mxu0 }
 0xa61   : > { %v2423_v40 = vsel %vm1028_vm4, %v3632_v39, -1e+30 }
 0xa62   : > { %v2322_v41 = vpop.f32.mrf.mxu0  ;;  %v2429_v42 = vsel %vm1039_vm3, %v2423_v40, -inf }
 0xa63   : > { %v2422_v43 = vsel %vm1028_vm4, %v2322_v41, -1e+30  ;;  %2430 = vmax.xlane.f32.xlu1 %v2429_v42 }
 0xa64   : > { %v2426_v44 = vsel %vm1039_vm3, %v2422_v43, -inf }
 0xa65   : > { %2427 = vmax.xlane.f32.xlu0 %v2426_v44 }
 0xa72   : > { %v4563_v45 = vpop.f32.mrf.mxu1 }
 0xa74   : > { %v4565_v46 = vpop.f32.mrf.mxu1 }
 0xa7a   : > { %v3639_v47 = vpop.f32.mrf.mxu1 }
 0xa7b   : > { %v2425_v51 = vsel %vm1028_vm4, %v3639_v47, -1e+30 }
 0xa7c   : > { %v2413_v48 = vpop.f32.mrf.mxu1  ;;  %v2435_v53 = vsel %vm1039_vm3, %v2425_v51, -inf }
 0xa7d   : > { %v2424_v49 = vsel %vm1028_vm4, %v2413_v48, -1e+30 }
 0xa7e   : > { %v2432_v50 = vsel %vm1039_vm3, %v2424_v49, -inf }
 0xa7f   : > { %2433 = vmax.xlane.f32.xlu0 %v2432_v50 }
 0xa83   : > { %2436 = vmax.xlane.f32.xlu0 %v2435_v53 }
 0xaec   : > { %v2431_v55 = vpop.xlane.xlu1 %2430 }
 0xaed   : > { %v2439_v56 = vsub.f32 %v2423_v40, %v2431_v55 }
 0xaee   : > { %v2428_v58 = vpop.xlane.xlu0 %2427 }
 0xaef   : > { %v2444_v59 = vmul.f32 1.442695, %v2439_v56  ;;  %v2438_v60 = vsub.f32 %v2422_v43, %v2428_v58 }
 0xaf1   : > { %3872 = vpow2.f32 %v2444_v59  ;;  %v2442_v61 = vmul.f32 1.442695, %v2438_v60 }
 0xaf3   : > { %3874 = vpow2.f32 %v2442_v61 }
 0xafe   : > { %v3873_v57 = vpop.eup %3872 }
 0xaff   : > { %v2453_v63 = vsel %vm1039_vm3, %v3873_v57, 0.0 }
 0xb00   : > { %v3875_v2 = vpop.eup %3874  ;;  %2454 = vadd.xlane.f32.xlu1 %v2453_v63 }
 0xb01   : > { %v2450_v13 = vsel %vm1039_vm3, %v3875_v2, 0.0 }
 0xb02   : > { %2451 = vadd.xlane.f32.xlu0 %v2450_v13 }
 0xb08   : > { %v2434_v52 = vpop.xlane.xlu0 %2433 }
 0xb09   : > { %v2440_v3 = vsub.f32 %v2424_v49, %v2434_v52 }
 0xb0b   : > { %v2446_v54 = vmul.f32 1.442695, %v2440_v3 }
 0xb0c   : > { %v2437_v0 = vpop.xlane.xlu0 %2436 }
 0xb0d   : > { %3876 = vpow2.f32 %v2446_v54  ;;  %v2441_v5 = vsub.f32 %v2425_v51, %v2437_v0 }
 0xb0f   : > { %v2448_v7 = vmul.f32 1.442695, %v2441_v5  ;;  %v3897_v5 = vld [vmem:[#allocation2] sm:$0xff] }
 0xb11   : > { %3878 = vpow2.f32 %v2448_v7 }
 0xb1a   : > { %v3877_v10 = vpop.eup %3876 }
 0xb1b   : > { %v2456_v1 = vsel %vm1039_vm3, %v3877_v10, 0.0 }
 0xb1c   : > { %2457 = vadd.xlane.f32.xlu0 %v2456_v1 }
 0xb1e   : > { %v3879_v4 = vpop.eup %3878 }
 0xb1f   : > { %v2459_v6 = vsel %vm1039_vm3, %v3879_v4, 0.0 }
 0xb20   : > { %2460 = vadd.xlane.f32.xlu1 %v2459_v6 }
 0xb31   : > { %2470 = vrot.lane.b32.xlu1 %v4365_v11, %s4022_s0 }
 0xb32   : > { %2472 = vrot.lane.b32.xlu0 %v4357_v8, %s4022_s0 }
 0xb35   : > { %2559 = vrot.lane.b32.xlu1 %v4370_v12, %s4022_s0 }
 0xb36   : > { %2648 = vrot.lane.b32.xlu0 %v4495_v29, %s4021_s22 }
 0xb39   : > { %2557 = vrot.lane.b32.xlu1 %v4333_v62, %s4022_s0 }
 0xb3a   : > { %2664 = vrot.lane.b32.xlu0 %v2144_v38, %s4019_s19  ;;  %v2706_v38 = vld [vmem:[%s4218_s21] sm:$0xff] }
 0xb3d   : > { %2650 = vrot.lane.b32.xlu1 %v4493_v28, %s4021_s22 }
 0xb41   : > { %2666 = vrot.lane.b32.xlu1 %v3618_v35, %s4019_s19  ;;  %v2707_v35 = vld [vmem:[%s4218_s21 + $0x8] sm:$0xff] }
 0xb89   : > { %v2455_v14 = vpop.xlane.xlu1 %2454 }
 0xb8b   : > { %v2452_v11 = vpop.xlane.xlu0 %2451 }
 0xb8c   : > { %3880 = vrcp.f32 %v2452_v11 }
 0xb8d   : > { %3882 = vrcp.f32 %v2455_v14  ;;  %v3899_v14 = vld [vmem:[#allocation2 + $0x10] sm:$0xff] }
 0xb99   : > { %v3881_v9 = vpop.eup %3880 }
 0xb9a   : > { %v2466_v8 = vmul.f32 %v3881_v9, %v3875_v2  ;;  %v3883_v62 = vpop.eup %3882  ;;  %v3898_v9 = vld [vmem:[#allocation2 + $0x18] sm:$0xff] }
 0xb9b   : > { %v2467_v28 = vmul.f32 %v3883_v62, %v3873_v57 }
 0xb9c   : > { %3644 = vmatprep.mubr.msk.f32.mxu0 %vm1039_vm3, %v2466_v8 }
 0xba5   : > { %v2458_v12 = vpop.xlane.xlu0 %2457 }
 0xba6   : > { %3884 = vrcp.f32 %v2458_v12 }
 0xba9   : > { %v2461_v29 = vpop.xlane.xlu1 %2460  ;;  %v2473_v15 = vpop.permute.xlu0 %2472 }
 0xbaa   : > { %3886 = vrcp.f32 %v2461_v29  ;;  %3640 = vmatprep.subr.mxu0 %v2473_v15 }
 0xbab   : > { %3641 = vmatpush3.msra.mxu0 %v2473_v15 }
 0xbad   : > { %v2471_v16 = vpop.permute.xlu1 %2470  ;;  %v2649_v44 = vpop.permute.xlu0 %2648 }
 0xbae   : > { %3642 = vmatprep.subr.mxu0 %v2471_v16 }
 0xbaf   : > { %3643 = vmatpush3.msra.mxu0 %v2471_v16 }
 0xbb0   : > { %3645 = vmatmul.mubr.msk.f32.vlgmr.msra.gmra.mxu0 %vm1039_vm3, %v2467_v28 }
 0xbb1   : > { %v2560_v17 = vpop.permute.xlu1 %2559  ;;  %v2665_v48 = vpop.permute.xlu0 %2664 }
 0xbb2   : > { %3647 = vmatprep.subr.mxu1 %v2560_v17 }
 0xbb3   : > { %v3885_v18 = vpop.eup %3884  ;;  %3648 = vmatpush3.msra.mxu1 %v2560_v17 }
 0xbb4   : > { %v2468_v19 = vmul.f32 %v3885_v18, %v3877_v10 }
 0xbb5   : > { %v2558_v20 = vpop.permute.xlu1 %2557 }
 0xbb6   : > { %3649 = vmatprep.subr.mxu1 %v2558_v20  ;;  %3651 = vmatprep.mubr.msk.f32.mxu1 %vm1039_vm3, %v2468_v19 }
 0xbb7   : > { %v3887_v25 = vpop.eup %3886  ;;  %3650 = vmatpush3.msra.mxu1 %v2558_v20 }
 0xbb8   : > { %v2469_v26 = vmul.f32 %v3887_v25, %v3879_v4  ;;  %3654 = vmatprep.subr.mxu1 %v2713_v27 }
 0xbb9   : > { %v2651_v43 = vpop.permute.xlu1 %2650 }
 0xbba   : > { %3652 = vmatmul.mubr.msk.f32.vlgmr.msra.gmra.mxu1 %vm1039_vm3, %v2469_v26 }
 0xbbb   : > { %3655 = vmatpush3.msra.mxu1 %v2713_v27 }
 0xbbc   : > { %3656 = vmatprep.subr.mxu1 %v2712_v30 }
 0xbbd   : > { %3657 = vmatpush3.msra.mxu1 %v2712_v30  ;;  %v2667_v47 = vpop.permute.xlu1 %2666 }
 0xbbe   : > { %3658 = vmatprep.subr.mxu1 %v2711_v31 }
 0xbbf   : > { %3659 = vmatpush3.msra.mxu1 %v2711_v31 }
 0xbc0   : > { %3660 = vmatprep.subr.mxu1 %v2710_v32 }
 0xbc1   : > { %3661 = vmatpush3.msra.mxu1 %v2710_v32 }
 0xbc2   : > { %3662 = vmatprep.subr.mxu1 %v2709_v33 }
 0xbc3   : > { %3663 = vmatpush3.msra.mxu1 %v2709_v33 }
 0xbc4   : > { %3664 = vmatprep.subr.mxu1 %v2708_v34 }
 0xbc5   : > { %3665 = vmatpush3.msra.mxu1 %v2708_v34 }
 0xbc6   : > { %3666 = vmatprep.subr.mxu1 %v2707_v35 }
 0xbc7   : > { %3667 = vmatpush3.msra.mxu1 %v2707_v35 }
 0xbc8   : > { %3668 = vmatprep.subr.mxu1 %v2706_v38 }
 0xbc9   : > { %3669 = vmatpush3.msra.mxu1 %v2706_v38 }
 0xc70   : > { %v3646_v39 = vpop.f32.mrf.mxu0 }
 0xc71   : > { %2682 = vrot.lane.b32.xlu1 %v3646_v39, %s4017_s27 }
 0xc72   : > { %v2548_v40 = vpop.f32.mrf.mxu0 }
 0xc73   : > { %2680 = vrot.lane.b32.xlu0 %v2548_v40, %s4017_s27 }
 0xc75   : > { %2654 = vrot.lane.b32.xlu1 %v4503_v36, %s4021_s22 }
 0xc77   : > { %2652 = vrot.lane.b32.xlu0 %v4505_v37, %s4021_s22  ;;  %v2692_v37 = vsel %vm1039_vm3, %v4437_v22, %v2649_v44  ;;  %v2907_v44 = vld [vmem:[%s4180_s30 + $0x38] sm:$0xff] }
 0xc78   : > { %3676 = vmatprep.subr.mxu1 %v2907_v44 }
 0xc79   : > { %2670 = vrot.lane.b32.xlu1 %v4563_v45, %s4019_s19  ;;  %v2697_v45 = vsel %vm2696_vm5, %v2692_v37, %v2665_v48  ;;  %v2905_v48 = vld [vmem:[%s4180_s30 + $0x28] sm:$0xff]  ;;  %v2903_v37 = vld [vmem:[%s4180_s30 + $0x18] sm:$0xff] }
 0xc7a   : > { %v3653_v41 = vpop.f32.mrf.mxu1 }
 0xc7b   : > { %2668 = vrot.lane.b32.xlu0 %v4565_v46, %s4019_s19  ;;  %v2693_v46 = vsel %vm1039_vm3, %v4435_v21, %v2651_v43 }
 0xc7c   : > { %v2635_v42 = vpop.f32.mrf.mxu1  ;;  %v2698_v50 = vsel %vm2696_vm5, %v2693_v46, %v2667_v47  ;;  %v2906_v47 = vld [vmem:[%s4180_s30 + $0x30] sm:$0xff]  ;;  %v2901_v46 = vld [vmem:[%s4180_s30 + $0x8] sm:$0xff] }
 0xc7d   : > { %2686 = vrot.lane.b32.xlu1 %v3653_v41, %s4017_s27 }
 0xc7f   : > { %2684 = vrot.lane.b32.xlu0 %v2635_v42, %s4017_s27 }
 0xce3   : > { %v2683_v36 = vpop.permute.xlu1 %2682 }
 0xce4   : > { %v2703_v53 = vsel %vm2701_vm6, %v2698_v50, %v2683_v36  ;;  %v2904_v36 = vld [vmem:[%s4180_s30 + $0x20] sm:$0xff]  ;;  %v3031_v50 = vld [vmem:[%s4235_s18 + $0x78] sm:$0xff] }
 0xce5   : > { %v2681_v49 = vpop.permute.xlu0 %2680  ;;  %3698 = vmatprep.subr.mxu0 %v3031_v50 }
 0xce6   : > { %v2702_v51 = vsel %vm2701_vm6, %v2697_v45, %v2681_v49  ;;  %v2902_v45 = vld [vmem:[%s4180_s30 + $0x10] sm:$0xff]  ;;  %v2900_v49 = vld [vmem:[%s4180_s30] sm:$0xff]  ;;  %3699 = vmatpush3.msra.mxu0 %v3031_v50 }
 0xce7   : > { %v2655_v55 = vpop.permute.xlu1 %2654  ;;  %3670 = vmatprep.mubr.msk.f32.mxu1 %vm823_vm2, %v2702_v51  ;;  %v3030_v51 = vld [vmem:[%s4235_s18 + $0x70] sm:$0xff] }
 0xce8   : > { %3671 = vmatmul.mubr.msk.f32.vlgmr.msra.gmra.mxu1 %vm823_vm2, %v2703_v53  ;;  %v2695_v60 = vsel %vm1039_vm3, %v4439_v23, %v2655_v55  ;;  %v3896_v23 = vld [vmem:[#allocation2 + $0x8] sm:$0xff]  ;;  %3700 = vmatprep.subr.mxu0 %v3030_v51  ;;  %v3028_v55 = vld [vmem:[%s4235_s18 + $0x60] sm:$0xff] }
 0xce9   : > { %v2653_v22 = vpop.permute.xlu0 %2652  ;;  %3677 = vmatpush3.msra.mxu1 %v2907_v44  ;;  %v3029_v53 = vld [vmem:[%s4235_s18 + $0x68] sm:$0xff]  ;;  %3701 = vmatpush3.msra.mxu0 %v3030_v51 }
 0xcea   : > { %v2694_v59 = vsel %vm1039_vm3, %v4441_v24, %v2653_v22  ;;  %v3416_v24 = vld [vmem:[%s4828_s26] ss:$0 sm:$0xff]  ;;  %3678 = vmatprep.subr.mxu1 %v2906_v47  ;;  %3702 = vmatprep.subr.mxu0 %v3029_v53  ;;  %v3027_v22 = vld [vmem:[%s4235_s18 + $0x58] sm:$0xff] }
 0xceb   : > { %v2671_v56 = vpop.permute.xlu1 %2670  ;;  %3679 = vmatpush3.msra.mxu1 %v2906_v47  ;;  %3703 = vmatpush3.msra.mxu0 %v3029_v53 }
 0xcec   : > { %v2700_v63 = vsel %vm2696_vm5, %v2695_v60, %v2671_v56  ;;  %3680 = vmatprep.subr.mxu1 %v2905_v48  ;;  %3704 = vmatprep.subr.mxu0 %v3028_v55  ;;  %v3026_v56 = vld [vmem:[%s4235_s18 + $0x50] sm:$0xff] }
 0xced   : > { %v2669_v58 = vpop.permute.xlu0 %2668  ;;  %3681 = vmatpush3.msra.mxu1 %v2905_v48  ;;  %3705 = vmatpush3.msra.mxu0 %v3028_v55  ;;  %v3022_v60 = vld [vmem:[%s4235_s18 + $0x30] sm:$0xff] }
 0xcee   : > { %v2699_v61 = vsel %vm2696_vm5, %v2694_v59, %v2669_v58  ;;  %3682 = vmatprep.subr.mxu1 %v2904_v36  ;;  %3706 = vmatprep.subr.mxu0 %v3027_v22  ;;  %v3025_v58 = vld [vmem:[%s4235_s18 + $0x48] sm:$0xff]  ;;  %v3024_v59 = vld [vmem:[%s4235_s18 + $0x40] sm:$0xff] }
 0xcef   : > { %v2687_v21 = vpop.permute.xlu1 %2686  ;;  %3683 = vmatpush3.msra.mxu1 %v2904_v36  ;;  %3707 = vmatpush3.msra.mxu0 %v3027_v22 }
 0xcf0   : > { %v2705_v13 = vsel %vm2701_vm6, %v2700_v63, %v2687_v21  ;;  %3684 = vmatprep.subr.mxu1 %v2903_v37  ;;  %3708 = vmatprep.subr.mxu0 %v3026_v56  ;;  %v3023_v21 = vld [vmem:[%s4235_s18 + $0x38] sm:$0xff] }
 0xcf1   : > { %v2685_v57 = vpop.permute.xlu0 %2684  ;;  %3685 = vmatpush3.msra.mxu1 %v2903_v37  ;;  %3709 = vmatpush3.msra.mxu0 %v3026_v56 }
 0xcf2   : > { %v2704_v2 = vsel %vm2701_vm6, %v2699_v61, %v2685_v57  ;;  %3686 = vmatprep.subr.mxu1 %v2902_v45  ;;  %3710 = vmatprep.subr.mxu0 %v3025_v58  ;;  %v3021_v61 = vld [vmem:[%s4235_s18 + $0x28] sm:$0xff]  ;;  %v3020_v57 = vld [vmem:[%s4235_s18 + $0x20] sm:$0xff] }
 0xcf3   : > { %3673 = vmatprep.mubr.msk.f32.mxu1 %vm823_vm2, %v2704_v2  ;;  %3687 = vmatpush3.msra.mxu1 %v2902_v45 }
 0xcf4   : > { %3674 = vmatmul.mubr.msk.f32.gmra.mxu1 %vm823_vm2, %v2705_v13  ;;  %3688 = vmatprep.subr.mxu1 %v2901_v46 }
 0xcf5   : > { %3689 = vmatpush3.msra.mxu1 %v2901_v46  ;;  %3711 = vmatpush3.msra.mxu0 %v3025_v58 }
 0xcf6   : > { %3690 = vmatprep.subr.mxu1 %v2900_v49  ;;  %3712 = vmatprep.subr.mxu0 %v3024_v59 }
 0xcf7   : > { %3691 = vmatpush3.msra.mxu1 %v2900_v49  ;;  %3713 = vmatpush3.msra.mxu0 %v3024_v59  ;;  %v3424_v49 = vld [vmem:[%s741_s17] ss:$0 sm:$0xff] }
 0xcf8   : > { %3714 = vmatprep.subr.mxu0 %v3023_v21 }
 0xcf9   : > { %3715 = vmatpush3.msra.mxu0 %v3023_v21 }
 0xcfa   : > { %3716 = vmatprep.subr.mxu0 %v3022_v60 }
 0xcfb   : > { %3717 = vmatpush3.msra.mxu0 %v3022_v60 }
 0xcfc   : > { %3718 = vmatprep.subr.mxu0 %v3021_v61 }
 0xcfd   : > { %3719 = vmatpush3.msra.mxu0 %v3021_v61 }
 0xcfe   : > { %3720 = vmatprep.subr.mxu0 %v3020_v57 }
 0xcff   : > { %3721 = vmatpush3.msra.mxu0 %v3020_v57 }
 0xda8   : > { %v3672_v52 = vpop.f32.mrf.mxu1 }
 0xda9   : > { %v2812_v3 = vadd.f32 %v3896_v23, %v3672_v52 }
 0xdaa   : > { %v2792_v54 = vpop.f32.mrf.mxu1 }
 0xdab   : > { %v4640_v0 = vadd.f32 %v3416_v24, %v2812_v3  ;;  %v2811_v7 = vadd.f32 %v3897_v5, %v2792_v54 }
 0xdad   : > { %v4642_v10 = vadd.f32 %v3416_v24, %v2811_v7  ;;  %v2831_v1 = vsel %vm823_vm2, %v4640_v0, 0.0 }
 0xdae   : > { %2832 = vadd.xlane.f32.xlu1 %v2831_v1 }
 0xdaf   : > { %v2828_v4 = vsel %vm823_vm2, %v4642_v10, 0.0 }
 0xdb0   : > { %2829 = vadd.xlane.f32.xlu0 %v2828_v4 }
 0xdb4   : > { %v3675_v6 = vpop.f32.mrf.mxu1 }
 0xdb5   : > { %v2814_v8 = vadd.f32 %v3898_v9, %v3675_v6 }
 0xdb6   : > { %v2802_v11 = vpop.f32.mrf.mxu1 }
 0xdb7   : > { %v2813_v12 = vadd.f32 %v3899_v14, %v2802_v11  ;;  %v4650_v15 = vadd.f32 %v3416_v24, %v2814_v8  ;;  %v3417_v11 = vld [vmem:[%s727_s2] ss:$0 sm:$0xff] }
 0xdb9   : > { %v4648_v29 = vadd.f32 %v3416_v24, %v2813_v12  ;;  %v2837_v16 = vsel %vm823_vm2, %v4650_v15, 0.0 }
 0xdbb   : > { %v2834_v62 = vsel %vm823_vm2, %v4648_v29, 0.0 }
 0xdbc   : > { %2835 = vadd.xlane.f32.xlu0 %v2834_v62  ;;  %v3418_v62 = vld [vmem:[%s730_s28] ss:$0 sm:$0xff] }
 0xdc0   : > { %2838 = vadd.xlane.f32.xlu0 %v2837_v16 }
 0xe37   : > { %v2833_v28 = vpop.xlane.xlu1 %2832 }
 0xe38   : > { %v2841_v17 = vmul.f32 0.015625, %v2833_v28 }
 0xe39   : > { %v2830_v18 = vpop.xlane.xlu0 %2829 }
 0xe3a   : > { %v4657_v19 = vsub.f32 %v4640_v0, %v2841_v17  ;;  %v2840_v20 = vmul.f32 0.015625, %v2830_v18 }
 0xe3c   : > { %v4660_v25 = vsub.f32 %v4642_v10, %v2840_v20  ;;  %v2849_v26 = vmul.f32 %v4657_v19, %v4657_v19 }
 0xe3e   : > { %v2855_v27 = vsel %vm823_vm2, %v2849_v26, 0.0  ;;  %v2848_v30 = vmul.f32 %v4660_v25, %v4660_v25 }
 0xe3f   : > { %2856 = vadd.xlane.f32.xlu1 %v2855_v27 }
 0xe40   : > { %v2852_v31 = vsel %vm823_vm2, %v2848_v30, 0.0 }
 0xe41   : > { %2853 = vadd.xlane.f32.xlu0 %v2852_v31 }
 0xe45   : > { %v2836_v32 = vpop.xlane.xlu0 %2835 }
 0xe46   : > { %v2842_v33 = vmul.f32 0.015625, %v2836_v32  ;;  %v3019_v32 = vld [vmem:[%s4235_s18 + $0x18] sm:$0xff] }
 0xe47   : > { %3722 = vmatprep.subr.mxu0 %v3019_v32 }
 0xe48   : > { %v4669_v34 = vsub.f32 %v4648_v29, %v2842_v33  ;;  %3723 = vmatpush3.msra.mxu0 %v3019_v32  ;;  %v3018_v33 = vld [vmem:[%s4235_s18 + $0x10] sm:$0xff] }
 0xe49   : > { %v2839_v35 = vpop.xlane.xlu0 %2838  ;;  %3724 = vmatprep.subr.mxu0 %v3018_v33 }
 0xe4a   : > { %v2843_v38 = vmul.f32 0.015625, %v2839_v35  ;;  %v2850_v39 = vmul.f32 %v4669_v34, %v4669_v34  ;;  %3725 = vmatpush3.msra.mxu0 %v3018_v33  ;;  %v3016_v35 = vld [vmem:[%s4235_s18] sm:$0xff] }
 0xe4c   : > { %v4674_v40 = vsub.f32 %v4650_v15, %v2843_v38  ;;  %v2858_v41 = vsel %vm823_vm2, %v2850_v39, 0.0  ;;  %v3419_v38 = vld [vmem:[%s733_s7] ss:$0 sm:$0xff] }
 0xe4d   : > { %2859 = vadd.xlane.f32.xlu0 %v2858_v41 }
 0xe4e   : > { %v2851_v42 = vmul.f32 %v4674_v40, %v4674_v40 }
 0xe50   : > { %v2861_v43 = vsel %vm823_vm2, %v2851_v42, 0.0 }
 0xe51   : > { %2862 = vadd.xlane.f32.xlu1 %v2861_v43 }
 0xec8   : > { %v2857_v63 = vpop.xlane.xlu1 %2856 }
 0xec9   : > { %v2865_v2 = vmul.f32 0.015625, %v2857_v63 }
 0xeca   : > { %v2854_v13 = vpop.xlane.xlu0 %2853 }
 0xecb   : > { %v2869_v52 = vadd.f32 1e-05, %v2865_v2  ;;  %v2864_v24 = vmul.f32 0.015625, %v2854_v13 }
 0xecd   : > { %3888 = vrsqrt.f32 %v2869_v52  ;;  %v2868_v23 = vadd.f32 1e-05, %v2864_v24 }
 0xecf   : > { %3890 = vrsqrt.f32 %v2868_v23 }
 0xed6   : > { %v2860_v3 = vpop.xlane.xlu0 %2859 }
 0xed7   : > { %v2866_v54 = vmul.f32 0.015625, %v2860_v3 }
 0xed9   : > { %v2870_v5 = vadd.f32 1e-05, %v2866_v54 }
 0xeda   : > { %v3889_v7 = vpop.eup %3888  ;;  %v2863_v1 = vpop.xlane.xlu1 %2862 }
 0xedb   : > { %v2877_v4 = vmul.f32 %v3889_v7, %v4657_v19  ;;  %3892 = vrsqrt.f32 %v2870_v5  ;;  %v2867_v6 = vmul.f32 0.015625, %v2863_v1 }
 0xedc   : > { %v3891_v9 = vpop.eup %3890 }
 0xedd   : > { %v2871_v8 = vadd.f32 1e-05, %v2867_v6  ;;  %v2876_v14 = vmul.f32 %v3891_v9, %v4660_v25  ;;  %v2887_v12 = vmul.f32 %v3417_v11, %v2877_v4 }
 0xedf   : > { %3894 = vrsqrt.f32 %v2871_v8  ;;  %v2886_v16 = vmul.f32 %v3417_v11, %v2876_v14  ;;  %v2897_v17 = vadd.f32 %v3418_v62, %v2887_v12 }
 0xee1   : > { %v2896_v28 = vadd.f32 %v3418_v62, %v2886_v16 }
 0xee3   : > { %3692 = vmatprep.mubr.msk.f32.mxu1 %vm823_vm2, %v2896_v28 }
 0xee4   : > { %3693 = vmatmul.mubr.msk.f32.vlgmr.msra.gmra.mxu1 %vm823_vm2, %v2897_v17 }
 0xee8   : > { %v3893_v18 = vpop.eup %3892 }
 0xee9   : > { %v2878_v19 = vmul.f32 %v3893_v18, %v4669_v34  ;;  %v3017_v34 = vld [vmem:[%s4235_s18 + $0x8] sm:$0xff] }
 0xeea   : > { %3726 = vmatprep.subr.mxu0 %v3017_v34 }
 0xeeb   : > { %v2888_v20 = vmul.f32 %v3417_v11, %v2878_v19  ;;  %3727 = vmatpush3.msra.mxu0 %v3017_v34 }
 0xeec   : > { %v3895_v25 = vpop.eup %3894  ;;  %3728 = vmatprep.subr.mxu0 %v3016_v35 }
 0xeed   : > { %v2898_v26 = vadd.f32 %v3418_v62, %v2888_v20  ;;  %v2879_v27 = vmul.f32 %v3895_v25, %v4674_v40  ;;  %3729 = vmatpush3.msra.mxu0 %v3016_v35 }
 0xeef   : > { %3695 = vmatprep.mubr.msk.f32.mxu1 %vm823_vm2, %v2898_v26  ;;  %v2889_v30 = vmul.f32 %v3417_v11, %v2879_v27 }
 0xef1   : > { %v2899_v31 = vadd.f32 %v3418_v62, %v2889_v30 }
 0xef3   : > { %3696 = vmatmul.mubr.msk.f32.gmra.mxu1 %vm823_vm2, %v2899_v31 }
 0xfa4   : > { %v3694_v39 = vpop.f32.mrf.mxu1 }
 0xfa5   : > { %v2999_v40 = vadd.f32 %v3694_v39, %v3419_v38 }
 0xfa6   : > { %v2993_v41 = vpop.f32.mrf.mxu1 }
 0xfa7   : > { %v2994_v42 = vadd.f32 %v3419_v38, %v2993_v41  ;;  %v3013_v44 = vmax.f32 %v2999_v40, 0.0 }
 0xfa9   : > { %v3012_v43 = vmax.f32 %v2994_v42, 0.0 }
 0xfab   : > { %3730 = vmatprep.mubr.f32.mxu0 %v3012_v43 }
 0xfac   : > { %3731 = vmatmul.mubr.f32.vlgmr.msra.gmra.mxu0 %v3013_v44 }
 0xfb3   : > { %v3697_v47 = vpop.f32.mrf.mxu1 }
 0xfb4   : > { %v3009_v48 = vadd.f32 %v3697_v47, %v3419_v38 }
 0xfb5   : > { %v3003_v36 = vpop.f32.mrf.mxu1 }
 0xfb6   : > { %v3004_v37 = vadd.f32 %v3419_v38, %v3003_v36  ;;  %v3015_v46 = vmax.f32 %v3009_v48, 0.0 }
 0xfb8   : > { %v3014_v45 = vmax.f32 %v3004_v37, 0.0 }
 0xfba   : > { %3733 = vmatprep.mubr.f32.mxu0 %v3014_v45 }
 0xfbb   : > { %3734 = vmatmul.mubr.f32.gmra.mxu0 %v3015_v46 }
0x106c   : > { %v3732_v50 = vpop.f32.mrf.mxu0 }
0x106d   : > { %v3111_v51 = vadd.f32 %v3732_v50, %v3424_v49 }
0x106e   : > { %v3105_v53 = vpop.f32.mrf.mxu0 }
0x106f   : > { %v3125_v55 = vadd.f32 %v3111_v51, %v4640_v0  ;;  %v3106_v22 = vadd.f32 %v3424_v49, %v3105_v53 }
0x1071   : > { %3129 = vst.msk [vmem:[#allocation2 + $0x8] sm:$0xff] %vm823_vm2, %v3125_v55  ;;  %v3124_v56 = vadd.f32 %v3106_v22, %v4642_v10 }
0x1073   : > { %3128 = vst.msk [vmem:[#allocation2] sm:$0xff] %vm823_vm2, %v3124_v56 }
0x107b   : > { %v3735_v58 = vpop.f32.mrf.mxu0 }
0x107c   : > { %v3121_v59 = vadd.f32 %v3735_v58, %v3424_v49 }
0x107d   : > { %v3115_v21 = vpop.f32.mrf.mxu0 }
0x107e   : > { %v3127_v60 = vadd.f32 %v3121_v59, %v4650_v15  ;;  %v3116_v61 = vadd.f32 %v3424_v49, %v3115_v21  ;;  %3135 = sbr.rel (%p3425_p9) target bundleno = 4231 (0x1087), region = 96 }
0x1080   : > { %3131 = vst.msk [vmem:[#allocation2 + $0x18] sm:$0xff] %vm823_vm2, %v3127_v60  ;;  %v3126_v57 = vadd.f32 %v3116_v61, %v4648_v29 }
0x1082   : > { %3130 = vst.msk [vmem:[#allocation2 + $0x10] sm:$0xff] %vm823_vm2, %v3126_v57 }
0x1083   : > { %v3138_v0 = vrot.slane %v3126_v57, 7  ;;  %vm3139_vm7 = vcmask 1041409   ;;  %vm3142_vm8 = vcmask 517120  }
0x1085   : > { %v3140_v10 = vsel %vm3139_vm7, %v3138_v0, %v3124_v56 }
0x1086   : > { %3143 = vst.msk [vmem:[#allocation6] sm:$0x3] %vm3142_vm8, %v3140_v10 }
0x1087 PF: > { %s4830_s3 = sld [smem:[#allocation12_spill]]  ;;  %s4023_s27 = smov [#allocation6]  }
0x1088   : > { %s3153_s23 = sshll.u32 %s4023_s27, 4  ;;  %s3154_s23 = int_to_ptr.vmem [resolvable:$true] %s3153_s23 }
0x1089   : > { %s3928_s19 = scalar_lea.vmem %s3154_s23, 32  ;;  %p3935_p0 = scmp.lt.s32.totalorder %s3154_s23, %s3154_s23 }
0x108a   : > { %p3929_p11 = scmp.ne.s32.totalorder %s3154_s23, %s3928_s19  ;;  %p3936_p1 = scmp.lt.s32.totalorder %s3928_s19, %s3928_s19 }
0x108c   : > { %p3937_p2 = por %p3936_p1, %p3935_p0 }
0x108d   : > { %s4831_s17 = sadd.s32 4294967295, %s4830_s3  }
0x108e   : > { %p4743_p10 = scmp.eq.s32.totalorder %s4831_s17, 1 }
0x1090   : > { %p3930_p12 = pnand %p3929_p11, %p4743_p10 }
0x1092   : > { %p3931_p13 = pneg %p3930_p12 }
0x1094   : > { %p3938_p3 = pnand %p3937_p2, %p3931_p13 }
0x1096   : > { %3941 = shalt.err (!%p3938_p3)
}
0x1097   : > { %s4833_s22 = sld [smem:[#allocation23_spill]] }
0x109d   : > { %3739 = dma.vmem_to_hbm [thread:$0]  (%p4743_p10), %s3154_s23, 32, %s4833_s22, [#allocation5]  }
0x109e   : > { %3981 = dma.done.wait (%p4743_p10), [#allocation5], 32  }
0x109f   : > { %3983 = vsyncadd (%p4743_p10), [#allocation5], 4294967264 }
0x10a0 PF: > { %s4834_s0 = sld [smem:[#allocation12_spill]] }
0x10a1   : > { %s4835_s21 = sld [smem:[#allocation9_spill]] }
0x10a2   : > { %s4836_s22 = sld [smem:[#allocation10_spill]] }
0x10a3   : > { %s4837_s23 = sld [smem:[#allocation14_spill]] }
0x10a4   : > { %s4838_s24 = sld [smem:[#allocation11_spill]] }
0x10a5   : > { %s4839_s25 = sld [smem:[#allocation13_spill]] }
0x10a6   : > { %s30_s26 = sadd.s32 1, %s4834_s0  }
0x10a7   : > { %p27_p4 = scmp.ge.s32.totalorder %s30_s26, 4  }
0x10a9   :  { %29 = sbr.rel (!%p27_p4) target bundleno = 15 (0xf), region = 166 }
0x10ae   :  { %3166 = vsyncpa [#allocation4], 1 }
0x10af   :  { %3168 = vsyncpa [#allocation4 + $0x1], 1 }
0x10b0   :  { %3169 = vsyncpa [#allocation5], 1 }
0x10b1   :  { %3171 = vsyncpa [#allocation5 + $0x1], 1 }

</bundles_post_ra>
